<compile_context>
chip_gen: v7x
topology: tpu7x:2x2x1
jax: 0.10.0
libtpu: 0.0.40
codegen_flags: <defaults>
</compile_context>

<pallas_src>
import math
import numpy as np
import jax
import jax.numpy as jnp
from jax import lax
from jax.experimental import pallas as pl
from jax.experimental.pallas import tpu as pltpu


def _round_up(x, m):
    return ((x + m - 1) // m) * m


def _lcm(a, b):
    return a * b // math.gcd(a, b)


# ----------------------------------------------------------------------------
# Kernel 1: BN1 statistics only.  Conv1d(2->C,k) evaluated as 2*K scalar-FMA
# broadcasts per channel; channel blocks on a 'parallel' grid axis, batch
# tiles on an 'arbitrary' axis with masked, exact sum / sum-of-squares
# accumulation into small revisited outputs.
# ----------------------------------------------------------------------------
def _make_stats_kernel(CB, TB, Dp, K, B_real, D_real):
    TWO_K = 2 * K
    need_row = (B_real % TB) != 0
    need_col = (Dp != D_real)

    def kernel(x_ref, w_ref, b_ref, ssum_ref, ssq_ref):
        cb = pl.program_id(0)
        i = pl.program_id(1)

        @pl.when(i == 0)
        def _():
            ssum_ref[...] = jnp.zeros_like(ssum_ref)
            ssq_ref[...] = jnp.zeros_like(ssq_ref)

        views = [x_ref[r] for r in range(TWO_K)]          # each (TB, Dp)

        mask = None
        if need_row or need_col:
            ok = None
            if need_row:
                rid = lax.broadcasted_iota(jnp.int32, (TB, Dp), 0) + i * TB
                ok = rid < B_real
            if need_col:
                cid = lax.broadcasted_iota(jnp.int32, (TB, Dp), 1)
                cm = cid < D_real
                ok = cm if ok is None else jnp.logical_and(ok, cm)
            mask = ok

        for g in range(CB):                               # bounded unroll (CB=8)
            c = cb * CB + g
            base = c * TWO_K
            acc = views[0] * w_ref[base]                   # SMEM scalar FMAs
            for r in range(1, TWO_K):
                acc = acc + views[r] * w_ref[base + r]
            acc = acc + b_ref[c]
            if mask is not None:
                acc = jnp.where(mask, acc, 0.0)
            ssum_ref[g:g + 1, :] += jnp.sum(acc, axis=0, keepdims=True)
            ssq_ref[g:g + 1, :] += jnp.sum(acc * acc, axis=0, keepdims=True)

    return kernel


def conv_bn1_stats(x_views, conv_w_flat, conv_b, *, Cp, Dp, K, B_real, D_real,
                   tile_b=256, channel_block=8):
    TWO_K = 2 * K
    B = x_views.shape[1]
    TB = min(tile_b, B)
    if TB < B:
        TB = max(8, (TB // 8) * 8)
    nb = pl.cdiv(B, TB)
    CB = channel_block if Cp % channel_block == 0 else Cp
    assert Cp % CB == 0
    ncb = Cp // CB
    kernel = _make_stats_kernel(CB, TB, Dp, K, B_real, D_real)
    return pl.pallas_call(
        kernel,
        out_shape=(jax.ShapeDtypeStruct((Cp, Dp), jnp.float32),
                   jax.ShapeDtypeStruct((Cp, Dp), jnp.float32)),
        grid=(ncb, nb),
        in_specs=[
            pl.BlockSpec((TWO_K, TB, Dp), lambda cb, i: (0, i, 0)),
            pl.BlockSpec(memory_space=pltpu.MemorySpace.SMEM),   # conv weights
            pl.BlockSpec(memory_space=pltpu.MemorySpace.SMEM),   # conv bias
        ],
        out_specs=(pl.BlockSpec((CB, Dp), lambda cb, i: (cb, 0)),
                   pl.BlockSpec((CB, Dp), lambda cb, i: (cb, 0))),
        compiler_params=pltpu.CompilerParams(
            dimension_semantics=("parallel", "arbitrary")),
    )(x_views, conv_w_flat, conv_b)


# ----------------------------------------------------------------------------
# Kernel 2: conv recompute + BN1 affine + ReLU fused into a channel-group
# chunked fc reduction.  Per grid step the G normalized (B,Dp) tiles are
# concatenated along lanes and contracted in ONE MXU dot with K=G*Dp against
# the pre-cast (G*Dp, Dp) weight block; f32 VMEM accumulator; fc bias + BN2
# (batch>1) + ReLU at the last step.
# ----------------------------------------------------------------------------
def _make_fc_kernel(G, K, apply_bn2, mm_dtype):
    TWO_K = 2 * K

    def kernel(x_ref, convw_ref, convb_ref, sc_ref, sh_ref, w_ref,
               bfc_ref, g2_ref, b2_ref, o_ref, acc_ref):
        kg = pl.program_id(0)

        @pl.when(kg == 0)
        def _():
            acc_ref[...] = jnp.zeros_like(acc_ref)

        views = [x_ref[r] for r in range(TWO_K)]          # each (B, Dp)

        hs = []
        for g in range(G):
            c = kg * G + g
            base = c * TWO_K
            h = views[0] * convw_ref[base]                 # conv recompute
            for r in range(1, TWO_K):
                h = h + views[r] * convw_ref[base + r]
            h = h + convb_ref[c]
            h = jnp.maximum(h * sc_ref[c] + sh_ref[c], 0.0)   # BN1 + ReLU
            hs.append(h.astype(mm_dtype))
        hcat = jnp.concatenate(hs, axis=1)                 # (B, G*Dp)

        acc_ref[...] += jnp.dot(hcat, w_ref[0],
                                preferred_element_type=jnp.float32)

        @pl.when(kg == pl.num_programs(0) - 1)
        def _():
            xv = acc_ref[...] + bfc_ref[...]
            # hidden_drop: p=0 -> identity
            if apply_bn2:                                  # bn2 only when batch>1
                mean = jnp.mean(xv, axis=0, keepdims=True)
                var = jnp.mean((xv - mean) ** 2, axis=0, keepdims=True)
                xv = (xv - mean) * lax.rsqrt(var + 1e-5)
                xv = xv * g2_ref[...] + b2_ref[...]
            o_ref[...] = jnp.maximum(xv, 0.0)              # ReLU

    return kernel


def fc_bn2_relu(x_views, conv_w_flat, conv_b, scale1, shift1, wfc_blk,
                fc_b, bn2_g, bn2_b, *, G, K, Dp, apply_bn2, mm_dtype):
    # TODO(synk): for very large batches / v7x dual-TC, add a parallel output-
    # column (Dp) grid axis; BN2 is per-feature so it splits cleanly by column.
    TWO_K = 2 * K
    B = x_views.shape[1]
    nk = wfc_blk.shape[0]
    kernel = _make_fc_kernel(G, K, apply_bn2, mm_dtype)
    return pl.pallas_call(
        kernel,
        out_shape=jax.ShapeDtypeStruct((B, Dp), jnp.float32),
        grid=(nk,),
        in_specs=[
            pl.BlockSpec((TWO_K, B, Dp), lambda k: (0, 0, 0)),       # x views
            pl.BlockSpec(memory_space=pltpu.MemorySpace.SMEM),       # conv w
            pl.BlockSpec(memory_space=pltpu.MemorySpace.SMEM),       # conv b
            pl.BlockSpec(memory_space=pltpu.MemorySpace.SMEM),       # bn1 scale
            pl.BlockSpec(memory_space=pltpu.MemorySpace.SMEM),       # bn1 shift
            pl.BlockSpec((1, G * Dp, Dp), lambda k: (k, 0, 0)),      # fc weight
            pl.BlockSpec((1, Dp), lambda k: (0, 0)),                 # fc bias
            pl.BlockSpec((1, Dp), lambda k: (0, 0)),                 # bn2 gamma
            pl.BlockSpec((1, Dp), lambda k: (0, 0)),                 # bn2 beta
        ],
        out_specs=pl.BlockSpec((B, Dp), lambda k: (0, 0)),
        scratch_shapes=[pltpu.VMEM((B, Dp), jnp.float32)],
        compiler_params=pltpu.CompilerParams(
            dimension_semantics=("arbitrary",)),
    )(x_views, conv_w_flat, conv_b, scale1, shift1, wfc_blk, fc_b, bn2_g, bn2_b)


# ----------------------------------------------------------------------------
# Kernel 3: entity scores (B, Dp) @ (Dp, E), tiled over a parallel 2-D grid.
# Entity axis is the SLOW grid axis so each (Dp, TE) entity tile is loaded
# once while the small batch tiles stream on the fast axis.
# ----------------------------------------------------------------------------
def _score_kernel(x_ref, e_ref, o_ref):
    o_ref[...] = jnp.dot(x_ref[...], e_ref[...],
                         preferred_element_type=jnp.float32)


def entity_scores(x_mm, e_t, *, tile_b=256, tile_e=2048):
    B, Dp = x_mm.shape
    _, E = e_t.shape
    TB = min(tile_b, B)
    if TB < B:
        TB = max(8, (TB // 8) * 8)
    TE = min(tile_e, E)
    if TE < E:
        TE = max(128, (TE // 128) * 128)
    nb, ne = pl.cdiv(B, TB), pl.cdiv(E, TE)
    itemsize = jnp.dtype(x_mm.dtype).itemsize
    cost = pl.CostEstimate(
        flops=int(2 * B * Dp * E), transcendentals=0,
        bytes_accessed=int(itemsize * (B * Dp + E * Dp) + 4 * B * E))
    return pl.pallas_call(
        _score_kernel,
        out_shape=jax.ShapeDtypeStruct((B, E), jnp.float32),
        grid=(ne, nb),
        in_specs=[pl.BlockSpec((TB, Dp), lambda i, j: (j, 0)),
                  pl.BlockSpec((Dp, TE), lambda i, j: (0, i))],
        out_specs=pl.BlockSpec((TB, TE), lambda i, j: (j, i)),
        compiler_params=pltpu.CompilerParams(
            dimension_semantics=("parallel", "parallel")),
        cost_estimate=cost,
    )(x_mm, e_t)


# ----------------------------------------------------------------------------
# Parameter init (shapes from ConvTransE.__init__) and one-time weight
# packing / padding / pre-casting (hoisted out of the forward).
# ----------------------------------------------------------------------------
def init_params(key, num_entities, embedding_dim, channels, kernel_size):
    k = jax.random.split(key, 4)
    return dict(
        conv_w=jax.random.normal(k[0], (channels, 2, kernel_size), jnp.float32) * 0.1,
        conv_b=jax.random.normal(k[1], (channels,), jnp.float32) * 0.1,
        fc_w=jax.random.normal(k[2], (embedding_dim, embedding_dim * channels),
                               jnp.float32) * 0.05,
        fc_b=jax.random.normal(k[3], (embedding_dim,), jnp.float32) * 0.05,
        bn0_g=jnp.ones((2,), jnp.float32), bn0_b=jnp.zeros((2,), jnp.float32),
        bn1_g=jnp.ones((channels,), jnp.float32), bn1_b=jnp.zeros((channels,), jnp.float32),
        bn2_g=jnp.ones((embedding_dim,), jnp.float32), bn2_b=jnp.zeros((embedding_dim,), jnp.float32),
        b_ent=jnp.zeros((num_entities,), jnp.float32),   # registered, unused in fwd
    )


def prepare_params(params, *, embedding_dim, channels, kernel_size, group=8,
                   mm_dtype=jnp.bfloat16):
    D, C, K = embedding_dim, channels, kernel_size
    assert K % 2 == 1, "only odd kernel sizes (stride-1 same-pad) supported"
    G = group
    Dp = _round_up(D, 128)
    Cp = _round_up(C, _lcm(G, 8))
    assert Cp % G == 0

    conv_w = jnp.zeros((Cp, 2 * K), jnp.float32).at[:C].set(
        params["conv_w"].reshape(C, 2 * K))
    conv_w_flat = conv_w.reshape(Cp * 2 * K)
    conv_b = jnp.zeros((Cp,), jnp.float32).at[:C].set(params["conv_b"])

    # fc weight (D_out, C*D_in) -> (C, D_in, D_out), zero-padded (Cp,Dp,Dp),
    # blocked to channel groups (Cp//G, G*Dp, Dp), pre-cast to mm_dtype.
    wfc = params["fc_w"].T.reshape(C, D, D)
    wfc3 = jnp.zeros((Cp, Dp, Dp), jnp.float32).at[:C, :D, :D].set(wfc)
    wfc_blk = wfc3.reshape(Cp // G, G * Dp, Dp).astype(mm_dtype)

    fc_b = jnp.zeros((1, Dp), jnp.float32).at[0, :D].set(params["fc_b"])
    bn2_g = jnp.zeros((1, Dp), jnp.float32).at[0, :D].set(params["bn2_g"])
    bn2_b = jnp.zeros((1, Dp), jnp.float32).at[0, :D].set(params["bn2_b"])
    bn1_g = jnp.zeros((Cp,), jnp.float32).at[:C].set(params["bn1_g"])
    bn1_b = jnp.zeros((Cp,), jnp.float32).at[:C].set(params["bn1_b"])

    return dict(
        D=D, Dp=Dp, C=C, Cp=Cp, K=K, G=G, mm_dtype=mm_dtype,
        conv_w_flat=conv_w_flat, conv_b=conv_b,
        wfc_blk=wfc_blk, fc_b=fc_b,
        bn0_g=params["bn0_g"], bn0_b=params["bn0_b"],
        bn1_g=bn1_g, bn1_b=bn1_b, bn2_g=bn2_g, bn2_b=bn2_b,
    )


# ----------------------------------------------------------------------------
# Forward wrapper (glue: normalize/tanh/gather/bn0/shifted-view prep + tiny
# BN1 finalize in plain JAX; hot paths run in the three Pallas kernels).
# ----------------------------------------------------------------------------
def convtranse_forward(prep, embedding, emb_rel, triplets, layer_norm=True,
                       history_tail_seq=None, one_hot_tail_seq=None,
                       conv_tile_b=256, score_tile_b=256, score_tile_e=2048):
    # TODO(synk): only the len(embedding)==1 branch of ConvTransE.forward is
    # implemented; the len==2/3 DecoderLayer/MultiHeadAttention paths and the
    # partial_embeding scoring path are not.
    assert len(embedding) == 1
    D, Dp, Cp, K, G = prep["D"], prep["Dp"], prep["Cp"], prep["K"], prep["G"]
    mm_dtype = prep["mm_dtype"]

    emb0 = embedding[0]                                   # (E, D)
    if layer_norm:
        nrm = jnp.sqrt(jnp.sum(emb0 * emb0, axis=1, keepdims=True))
        e1_all = emb0 / jnp.maximum(nrm, 1e-12)           # F.normalize(p=2, dim=1)
    else:
        e1_all = emb0
    e1_all = jnp.tanh(e1_all)
    # Lane-padded, pre-transposed, pre-cast entity table -> (Dp, E) mm_dtype.
    e_t = jnp.pad(e1_all, ((0, 0), (0, Dp - D))).T.astype(mm_dtype)

    e1 = e1_all[triplets[:, 0]]                           # (B, D)
    rel = emb_rel[-1][triplets[:, 1]]                     # (B, D)
    stacked = jnp.stack([e1, rel], axis=0)                # (2, B, D)
    B = stacked.shape[1]

    # bn0: training-mode batch stats per input channel over (batch, width).
    mean0 = jnp.mean(stacked, axis=(1, 2), keepdims=True)
    var0 = jnp.mean((stacked - mean0) ** 2, axis=(1, 2), keepdims=True)
    x = (stacked - mean0) * lax.rsqrt(var0 + 1e-5)
    x = x * prep["bn0_g"][:, None, None] + prep["bn0_b"][:, None, None]
    # inp_drop / feature_map_drop: p=0 -> identity

    # K host-side shifted, lane-dense views of the conv input: (2K, B, Dp).
    pad = K // 2
    xp = jnp.pad(x, ((0, 0), (0, 0), (pad, pad)))
    x_views = jnp.stack([xp[ic, :, k:k + D] for ic in range(2)
                         for k in range(K)], axis=0)          # (2K, B, D)
    x_views = jnp.pad(x_views, ((0, 0), (0, 0), (0, Dp - D)))  # (2K, B, Dp)

    # Pass 1: exact BN1 sum / sum-of-squares statistics.
    ssum, ssq = conv_bn1_stats(x_views, prep["conv_w_flat"], prep["conv_b"],
                               Cp=Cp, Dp=Dp, K=K, B_real=B, D_real=D,
                               tile_b=conv_tile_b)

    # Finalize BN1 (tiny (Cp,) math), fold gamma/beta into scale/shift.
    cnt = float(B * D)
    mean1 = jnp.sum(ssum, axis=1) / cnt
    var1 = jnp.maximum(jnp.sum(ssq, axis=1) / cnt - mean1 * mean1, 0.0)
    inv1 = lax.rsqrt(var1 + 1e-5)
    scale1 = prep["bn1_g"] * inv1
    shift1 = prep["bn1_b"] - mean1 * scale1

    # Pass 2: conv recompute + BN1 affine + ReLU fused into the chunked fc
    # reduction; fc bias + bn2 (batch>1) + ReLU at the last chunk.
    info_p = fc_bn2_relu(x_views, prep["conv_w_flat"], prep["conv_b"],
                         scale1, shift1, prep["wfc_blk"], prep["fc_b"],
                         prep["bn2_g"], prep["bn2_b"], G=G, K=K, Dp=Dp,
                         apply_bn2=(B > 1), mm_dtype=mm_dtype)   # (B, Dp) f32

    # Entity scores: (B, Dp) @ (Dp, E) over a parallel 2-D tile grid.
    scores = entity_scores(info_p.astype(mm_dtype), e_t,
                           tile_b=score_tile_b, tile_e=score_tile_e)  # (B, E)

    info_x = info_p[:, :D]

    if history_tail_seq is not None and one_hot_tail_seq is not None:
        history_mask = (one_hot_tail_seq == 0).astype(jnp.float32) * (-100.0)
        temp_mask = (one_hot_tail_seq == 0).astype(jnp.float32) * (-1e9)
        history_frequency = jax.nn.softmax(history_tail_seq + temp_mask, axis=1) * 0.5
        final_score = history_mask + history_frequency + scores
    else:
        final_score = scores
    return final_score, info_x


# ----------------------------------------------------------------------------
# Pure-JAX reference of the same math (no Pallas) for the correctness check.
# ----------------------------------------------------------------------------
def _reference_forward(params, embedding, emb_rel, triplets, layer_norm=True):
    emb0 = embedding[0]
    if layer_norm:
        nrm = jnp.sqrt(jnp.sum(emb0 * emb0, axis=1, keepdims=True))
        e1_all = emb0 / jnp.maximum(nrm, 1e-12)
    else:
        e1_all = emb0
    e1_all = jnp.tanh(e1_all)
    e1 = e1_all[triplets[:, 0]]
    rel = emb_rel[-1][triplets[:, 1]]
    stacked = jnp.stack([e1, rel], axis=1)                 # (B, 2, D)
    mean0 = jnp.mean(stacked, axis=(0, 2), keepdims=True)
    var0 = jnp.mean((stacked - mean0) ** 2, axis=(0, 2), keepdims=True)
    x = (stacked - mean0) / jnp.sqrt(var0 + 1e-5)
    x = x * params["bn0_g"][None, :, None] + params["bn0_b"][None, :, None]
    B, _, D = x.shape
    C, _, K = params["conv_w"].shape
    pad = K // 2
    xp = jnp.pad(x, ((0, 0), (0, 0), (pad, pad)))
    conv = jnp.stack([
        sum(xp[:, ic, k:k + D] * params["conv_w"][c, ic, k]
            for ic in range(2) for k in range(K)) + params["conv_b"][c]
        for c in range(C)], axis=1)                        # (B, C, D)
    m1 = jnp.mean(conv, axis=(0, 2), keepdims=True)
    v1 = jnp.mean((conv - m1) ** 2, axis=(0, 2), keepdims=True)
    h = (conv - m1) / jnp.sqrt(v1 + 1e-5)
    h = h * params["bn1_g"][None, :, None] + params["bn1_b"][None, :, None]
    h = jnp.maximum(h, 0.0)
    h_flat = h.reshape(B, -1)
    xf = h_flat @ params["fc_w"].T + params["fc_b"]
    if B > 1:
        m2 = jnp.mean(xf, axis=0, keepdims=True)
        v2 = jnp.mean((xf - m2) ** 2, axis=0, keepdims=True)
        xf = (xf - m2) / jnp.sqrt(v2 + 1e-5)
        xf = xf * params["bn2_g"] + params["bn2_b"]
    xf = jnp.maximum(xf, 0.0)
    return xf @ e1_all.T, xf


if __name__ == "__main__":
    # Small shapes; tiles chosen so partial batch/entity tiles and the stats
    # masking paths are all exercised.
    num_entities, embedding_dim, channels, kernel_size = 1280, 48, 10, 3
    num_rels2, batch = 20, 24

    key = jax.random.PRNGKey(0)
    kp, ke, kr, kt1, kt2 = jax.random.split(key, 5)
    params = init_params(kp, num_entities, embedding_dim, channels, kernel_size)

    embedding = [jax.random.normal(ke, (num_entities, embedding_dim), jnp.float32)]
    emb_rel = jax.random.normal(kr, (1, num_rels2, embedding_dim), jnp.float32)
    triplets = jnp.stack([
        jax.random.randint(kt1, (batch,), 0, num_entities),
        jax.random.randint(kt2, (batch,), 0, num_rels2),
        jax.random.randint(kt1, (batch,), 0, num_entities),
    ], axis=1).astype(jnp.int32)                                     # (B, 3)

    # f32 matmul path under full-precision matmuls on both sides -> tight check.
    with jax.default_matmul_precision("float32"):
        ref_score, ref_info = _reference_forward(params, embedding, emb_rel,
                                                 triplets, layer_norm=True)
        prep32 = prepare_params(params, embedding_dim=embedding_dim,
                                channels=channels, kernel_size=kernel_size,
                                group=8, mm_dtype=jnp.float32)
        score32, info32 = convtranse_forward(
            prep32, embedding, emb_rel, triplets, layer_norm=True,
            history_tail_seq=None, one_hot_tail_seq=None,
            conv_tile_b=16, score_tile_b=16, score_tile_e=512)
    score32 = jax.block_until_ready(score32)
    info32 = jax.block_until_ready(info32)
    ref_score = jax.block_until_ready(ref_score)
    np.testing.assert_allclose(np.asarray(score32), np.asarray(ref_score),
                               rtol=5e-4, atol=5e-4)
    np.testing.assert_allclose(np.asarray(info32), np.asarray(ref_info),
                               rtol=5e-4, atol=5e-4)

    # bf16 matmul path (default): pre-cast fc weight / entity table, halved
    # HBM bytes + native MXU bf16.  Loose tolerance vs f32 reference.
    prep16 = prepare_params(params, embedding_dim=embedding_dim,
                            channels=channels, kernel_size=kernel_size,
                            group=8, mm_dtype=jnp.bfloat16)
    score16, info16 = convtranse_forward(prep16, embedding, emb_rel, triplets,
                                         layer_norm=True)
    score16 = jax.block_until_ready(score16)
    np.testing.assert_allclose(np.asarray(score16), np.asarray(ref_score),
                               rtol=0.1, atol=0.1)

    print("KERNEL_OK")
</pallas_src>

<mosaic_0001>
module attributes {stable_mosaic.version = 11 : i64} {
  func.func @kernel(%arg0: i32, %arg1: i32, %arg2: memref<6x16x128xf32, #tpu.memory_space<vmem>>, %arg3: memref<96xf32, #tpu.memory_space<smem>>, %arg4: memref<16xf32, #tpu.memory_space<smem>>, %arg5: memref<8x128xf32, #tpu.memory_space<vmem>>, %arg6: memref<8x128xf32, #tpu.memory_space<vmem>>) attributes {dimension_semantics = [#tpu.dimension_semantics<parallel>, #tpu.dimension_semantics<arbitrary>], iteration_bounds = array<i64: 2, 2>, scalar_prefetch = 0 : i64, scratch_operands = 0 : i64, tpu.core_type = #tpu.core_type<tc>, window_params = [{transform_indices = @transform_0, window_bounds = array<i64: 6, 16, 128>}, {transform_indices = @transform_1, window_bounds = array<i64: 96>}, {transform_indices = @transform_2, window_bounds = array<i64: 16>}, {transform_indices = @transform_3, window_bounds = array<i64: 8, 128>}, {transform_indices = @transform_4, window_bounds = array<i64: 8, 128>}]} {
    %c0_i32 = arith.constant 0 : i32
    %0 = arith.cmpi eq, %arg1, %c0_i32 : i32
    %1 = arith.extui %0 : i1 to i32
    %c0_i32_0 = arith.constant 0 : i32
    %2 = arith.cmpi ne, %1, %c0_i32_0 : i32
    scf.if %2 {
      %cst_154 = arith.constant 0.000000e+00 : f32
      %457 = vector.broadcast %cst_154 : f32 to vector<8x128xf32>
      %c0_155 = arith.constant 0 : index
      %c0_156 = arith.constant 0 : index
      %458 = vector.load %arg5[%c0_155, %c0_156] : memref<8x128xf32, #tpu.memory_space<vmem>>, vector<8x128xf32>
      tpu.vector_store %arg5[%c0_155, %c0_156], %457 {strides = array<i32>} : memref<8x128xf32, #tpu.memory_space<vmem>>, vector<8x128xf32>,
      %cst_157 = arith.constant 0.000000e+00 : f32
      %459 = vector.broadcast %cst_157 : f32 to vector<8x128xf32>
      %c0_158 = arith.constant 0 : index
      %c0_159 = arith.constant 0 : index
      %460 = vector.load %arg6[%c0_158, %c0_159] : memref<8x128xf32, #tpu.memory_space<vmem>>, vector<8x128xf32>
      tpu.vector_store %arg6[%c0_158, %c0_159], %459 {strides = array<i32>} : memref<8x128xf32, #tpu.memory_space<vmem>>, vector<8x128xf32>,
    } else {
    }
    %c0 = arith.constant 0 : index
    %c0_1 = arith.constant 0 : index
    %c0_2 = arith.constant 0 : index
    %3 = vector.load %arg2[%c0, %c0_1, %c0_2] : memref<6x16x128xf32, #tpu.memory_space<vmem>>, vector<1x16x128xf32>
    %4 = vector.shape_cast %3 : vector<1x16x128xf32> to vector<16x128xf32>
    %c1 = arith.constant 1 : index
    %c0_3 = arith.constant 0 : index
    %c0_4 = arith.constant 0 : index
    %5 = vector.load %arg2[%c1, %c0_3, %c0_4] : memref<6x16x128xf32, #tpu.memory_space<vmem>>, vector<1x16x128xf32>
    %6 = vector.shape_cast %5 : vector<1x16x128xf32> to vector<16x128xf32>
    %c2 = arith.constant 2 : index
    %c0_5 = arith.constant 0 : index
    %c0_6 = arith.constant 0 : index
    %7 = vector.load %arg2[%c2, %c0_5, %c0_6] : memref<6x16x128xf32, #tpu.memory_space<vmem>>, vector<1x16x128xf32>
    %8 = vector.shape_cast %7 : vector<1x16x128xf32> to vector<16x128xf32>
    %c3 = arith.constant 3 : index
    %c0_7 = arith.constant 0 : index
    %c0_8 = arith.constant 0 : index
    %9 = vector.load %arg2[%c3, %c0_7, %c0_8] : memref<6x16x128xf32, #tpu.memory_space<vmem>>, vector<1x16x128xf32>
    %10 = vector.shape_cast %9 : vector<1x16x128xf32> to vector<16x128xf32>
    %c4 = arith.constant 4 : index
    %c0_9 = arith.constant 0 : index
    %c0_10 = arith.constant 0 : index
    %11 = vector.load %arg2[%c4, %c0_9, %c0_10] : memref<6x16x128xf32, #tpu.memory_space<vmem>>, vector<1x16x128xf32>
    %12 = vector.shape_cast %11 : vector<1x16x128xf32> to vector<16x128xf32>
    %c5 = arith.constant 5 : index
    %c0_11 = arith.constant 0 : index
    %c0_12 = arith.constant 0 : index
    %13 = vector.load %arg2[%c5, %c0_11, %c0_12] : memref<6x16x128xf32, #tpu.memory_space<vmem>>, vector<1x16x128xf32>
    %14 = vector.shape_cast %13 : vector<1x16x128xf32> to vector<16x128xf32>
    %15 = tpu.iota {dimensions = array<i32: 0>} : vector<16x128xi32>
    %c16_i32 = arith.constant 16 : i32
    %16 = arith.muli %arg1, %c16_i32 : i32
    %17 = vector.broadcast %16 : i32 to vector<16x128xi32>
    %18 = arith.addi %15, %17 : vector<16x128xi32>
    %c24_i32 = arith.constant 24 : i32
    %19 = vector.broadcast %c24_i32 : i32 to vector<16x128xi32>
    %20 = arith.cmpi slt, %18, %19 : vector<16x128xi32>
    %21 = tpu.iota {dimensions = array<i32: 1>} : vector<16x128xi32>
    %c48_i32 = arith.constant 48 : i32
    %22 = vector.broadcast %c48_i32 : i32 to vector<16x128xi32>
    %23 = arith.cmpi slt, %21, %22 : vector<16x128xi32>
    %24 = arith.andi %20, %23 : vector<16x128xi1>
    %c8_i32 = arith.constant 8 : i32
    %25 = arith.muli %arg0, %c8_i32 : i32
    %c0_i32_13 = arith.constant 0 : i32
    %26 = arith.addi %25, %c0_i32_13 : i32
    %c6_i32 = arith.constant 6 : i32
    %27 = arith.muli %26, %c6_i32 : i32
    %28 = arith.index_cast %27 : i32 to index
    %29 = memref.load %arg3[%28] : memref<96xf32, #tpu.memory_space<smem>>
    %30 = vector.broadcast %29 : f32 to vector<16x128xf32>
    %31 = arith.mulf %4, %30 : vector<16x128xf32>
    %c1_i32 = arith.constant 1 : i32
    %32 = arith.addi %27, %c1_i32 : i32
    %33 = arith.index_cast %32 : i32 to index
    %34 = memref.load %arg3[%33] : memref<96xf32, #tpu.memory_space<smem>>
    %35 = vector.broadcast %34 : f32 to vector<16x128xf32>
    %36 = arith.mulf %6, %35 : vector<16x128xf32>
    %37 = arith.addf %31, %36 : vector<16x128xf32>
    %c2_i32 = arith.constant 2 : i32
    %38 = arith.addi %27, %c2_i32 : i32
    %39 = arith.index_cast %38 : i32 to index
    %40 = memref.load %arg3[%39] : memref<96xf32, #tpu.memory_space<smem>>
    %41 = vector.broadcast %40 : f32 to vector<16x128xf32>
    %42 = arith.mulf %8, %41 : vector<16x128xf32>
    %43 = arith.addf %37, %42 : vector<16x128xf32>
    %c3_i32 = arith.constant 3 : i32
    %44 = arith.addi %27, %c3_i32 : i32
    %45 = arith.index_cast %44 : i32 to index
    %46 = memref.load %arg3[%45] : memref<96xf32, #tpu.memory_space<smem>>
    %47 = vector.broadcast %46 : f32 to vector<16x128xf32>
    %48 = arith.mulf %10, %47 : vector<16x128xf32>
    %49 = arith.addf %43, %48 : vector<16x128xf32>
    %c4_i32 = arith.constant 4 : i32
    %50 = arith.addi %27, %c4_i32 : i32
    %51 = arith.index_cast %50 : i32 to index
    %52 = memref.load %arg3[%51] : memref<96xf32, #tpu.memory_space<smem>>
    %53 = vector.broadcast %52 : f32 to vector<16x128xf32>
    %54 = arith.mulf %12, %53 : vector<16x128xf32>
    %55 = arith.addf %49, %54 : vector<16x128xf32>
    %c5_i32 = arith.constant 5 : i32
    %56 = arith.addi %27, %c5_i32 : i32
    %57 = arith.index_cast %56 : i32 to index
    %58 = memref.load %arg3[%57] : memref<96xf32, #tpu.memory_space<smem>>
    %59 = vector.broadcast %58 : f32 to vector<16x128xf32>
    %60 = arith.mulf %14, %59 : vector<16x128xf32>
    %61 = arith.addf %55, %60 : vector<16x128xf32>
    %62 = arith.index_cast %26 : i32 to index
    %63 = memref.load %arg4[%62] : memref<16xf32, #tpu.memory_space<smem>>
    %64 = vector.broadcast %63 : f32 to vector<16x128xf32>
    %65 = arith.addf %61, %64 : vector<16x128xf32>
    %cst = arith.constant 0.000000e+00 : f32
    %66 = vector.broadcast %cst : f32 to vector<16x128xf32>
    %67 = arith.select %24, %65, %66 : vector<16x128xi1>, vector<16x128xf32>
    %c0_14 = arith.constant 0 : index
    %c0_15 = arith.constant 0 : index
    %68 = vector.load %arg5[%c0_14, %c0_15] : memref<8x128xf32, #tpu.memory_space<vmem>>, vector<1x128xf32>
    %cst_16 = arith.constant dense<0.000000e+00> : vector<128xf32>
    %69 = vector.multi_reduction <add>, %67, %cst_16 [0] : vector<16x128xf32> to vector<128xf32>
    %70 = vector.shape_cast %69 : vector<128xf32> to vector<1x128xf32>
    %71 = arith.addf %68, %70 : vector<1x128xf32>
    %c0_17 = arith.constant 0 : index
    %c0_18 = arith.constant 0 : index
    %72 = vector.load %arg5[%c0_17, %c0_18] : memref<8x128xf32, #tpu.memory_space<vmem>>, vector<1x128xf32>
    tpu.vector_store %arg5[%c0_17, %c0_18], %71 {strides = array<i32>} : memref<8x128xf32, #tpu.memory_space<vmem>>, vector<1x128xf32>,
    %c0_19 = arith.constant 0 : index
    %c0_20 = arith.constant 0 : index
    %73 = vector.load %arg6[%c0_19, %c0_20] : memref<8x128xf32, #tpu.memory_space<vmem>>, vector<1x128xf32>
    %74 = arith.mulf %67, %67 : vector<16x128xf32>
    %cst_21 = arith.constant dense<0.000000e+00> : vector<128xf32>
    %75 = vector.multi_reduction <add>, %74, %cst_21 [0] : vector<16x128xf32> to vector<128xf32>
    %76 = vector.shape_cast %75 : vector<128xf32> to vector<1x128xf32>
    %77 = arith.addf %73, %76 : vector<1x128xf32>
    %c0_22 = arith.constant 0 : index
    %c0_23 = arith.constant 0 : index
    %78 = vector.load %arg6[%c0_22, %c0_23] : memref<8x128xf32, #tpu.memory_space<vmem>>, vector<1x128xf32>
    tpu.vector_store %arg6[%c0_22, %c0_23], %77 {strides = array<i32>} : memref<8x128xf32, #tpu.memory_space<vmem>>, vector<1x128xf32>,
    %c8_i32_24 = arith.constant 8 : i32
    %79 = arith.muli %arg0, %c8_i32_24 : i32
    %c1_i32_25 = arith.constant 1 : i32
    %80 = arith.addi %79, %c1_i32_25 : i32
    %c6_i32_26 = arith.constant 6 : i32
    %81 = arith.muli %80, %c6_i32_26 : i32
    %82 = arith.index_cast %81 : i32 to index
    %83 = memref.load %arg3[%82] : memref<96xf32, #tpu.memory_space<smem>>
    %84 = vector.broadcast %83 : f32 to vector<16x128xf32>
    %85 = arith.mulf %4, %84 : vector<16x128xf32>
    %c1_i32_27 = arith.constant 1 : i32
    %86 = arith.addi %81, %c1_i32_27 : i32
    %87 = arith.index_cast %86 : i32 to index
    %88 = memref.load %arg3[%87] : memref<96xf32, #tpu.memory_space<smem>>
    %89 = vector.broadcast %88 : f32 to vector<16x128xf32>
    %90 = arith.mulf %6, %89 : vector<16x128xf32>
    %91 = arith.addf %85, %90 : vector<16x128xf32>
    %c2_i32_28 = arith.constant 2 : i32
    %92 = arith.addi %81, %c2_i32_28 : i32
    %93 = arith.index_cast %92 : i32 to index
    %94 = memref.load %arg3[%93] : memref<96xf32, #tpu.memory_space<smem>>
    %95 = vector.broadcast %94 : f32 to vector<16x128xf32>
    %96 = arith.mulf %8, %95 : vector<16x128xf32>
    %97 = arith.addf %91, %96 : vector<16x128xf32>
    %c3_i32_29 = arith.constant 3 : i32
    %98 = arith.addi %81, %c3_i32_29 : i32
    %99 = arith.index_cast %98 : i32 to index
    %100 = memref.load %arg3[%99] : memref<96xf32, #tpu.memory_space<smem>>
    %101 = vector.broadcast %100 : f32 to vector<16x128xf32>
    %102 = arith.mulf %10, %101 : vector<16x128xf32>
    %103 = arith.addf %97, %102 : vector<16x128xf32>
    %c4_i32_30 = arith.constant 4 : i32
    %104 = arith.addi %81, %c4_i32_30 : i32
    %105 = arith.index_cast %104 : i32 to index
    %106 = memref.load %arg3[%105] : memref<96xf32, #tpu.memory_space<smem>>
    %107 = vector.broadcast %106 : f32 to vector<16x128xf32>
    %108 = arith.mulf %12, %107 : vector<16x128xf32>
    %109 = arith.addf %103, %108 : vector<16x128xf32>
    %c5_i32_31 = arith.constant 5 : i32
    %110 = arith.addi %81, %c5_i32_31 : i32
    %111 = arith.index_cast %110 : i32 to index
    %112 = memref.load %arg3[%111] : memref<96xf32, #tpu.memory_space<smem>>
    %113 = vector.broadcast %112 : f32 to vector<16x128xf32>
    %114 = arith.mulf %14, %113 : vector<16x128xf32>
    %115 = arith.addf %109, %114 : vector<16x128xf32>
    %116 = arith.index_cast %80 : i32 to index
    %117 = memref.load %arg4[%116] : memref<16xf32, #tpu.memory_space<smem>>
    %118 = vector.broadcast %117 : f32 to vector<16x128xf32>
    %119 = arith.addf %115, %118 : vector<16x128xf32>
    %cst_32 = arith.constant 0.000000e+00 : f32
    %120 = vector.broadcast %cst_32 : f32 to vector<16x128xf32>
    %121 = arith.select %24, %119, %120 : vector<16x128xi1>, vector<16x128xf32>
    %c1_33 = arith.constant 1 : index
    %c0_34 = arith.constant 0 : index
    %122 = vector.load %arg5[%c1_33, %c0_34] : memref<8x128xf32, #tpu.memory_space<vmem>>, vector<1x128xf32>
    %cst_35 = arith.constant dense<0.000000e+00> : vector<128xf32>
    %123 = vector.multi_reduction <add>, %121, %cst_35 [0] : vector<16x128xf32> to vector<128xf32>
    %124 = vector.shape_cast %123 : vector<128xf32> to vector<1x128xf32>
    %125 = arith.addf %122, %124 : vector<1x128xf32>
    %c1_36 = arith.constant 1 : index
    %c0_37 = arith.constant 0 : index
    %126 = vector.load %arg5[%c1_36, %c0_37] : memref<8x128xf32, #tpu.memory_space<vmem>>, vector<1x128xf32>
    tpu.vector_store %arg5[%c1_36, %c0_37], %125 {strides = array<i32>} : memref<8x128xf32, #tpu.memory_space<vmem>>, vector<1x128xf32>,
    %c1_38 = arith.constant 1 : index
    %c0_39 = arith.constant 0 : index
    %127 = vector.load %arg6[%c1_38, %c0_39] : memref<8x128xf32, #tpu.memory_space<vmem>>, vector<1x128xf32>
    %128 = arith.mulf %121, %121 : vector<16x128xf32>
    %cst_40 = arith.constant dense<0.000000e+00> : vector<128xf32>
    %129 = vector.multi_reduction <add>, %128, %cst_40 [0] : vector<16x128xf32> to vector<128xf32>
    %130 = vector.shape_cast %129 : vector<128xf32> to vector<1x128xf32>
    %131 = arith.addf %127, %130 : vector<1x128xf32>
    %c1_41 = arith.constant 1 : index
    %c0_42 = arith.constant 0 : index
    %132 = vector.load %arg6[%c1_41, %c0_42] : memref<8x128xf32, #tpu.memory_space<vmem>>, vector<1x128xf32>
    tpu.vector_store %arg6[%c1_41, %c0_42], %131 {strides = array<i32>} : memref<8x128xf32, #tpu.memory_space<vmem>>, vector<1x128xf32>,
    %c8_i32_43 = arith.constant 8 : i32
    %133 = arith.muli %arg0, %c8_i32_43 : i32
    %c2_i32_44 = arith.constant 2 : i32
    %134 = arith.addi %133, %c2_i32_44 : i32
    %c6_i32_45 = arith.constant 6 : i32
    %135 = arith.muli %134, %c6_i32_45 : i32
    %136 = arith.index_cast %135 : i32 to index
    %137 = memref.load %arg3[%136] : memref<96xf32, #tpu.memory_space<smem>>
    %138 = vector.broadcast %137 : f32 to vector<16x128xf32>
    %139 = arith.mulf %4, %138 : vector<16x128xf32>
    %c1_i32_46 = arith.constant 1 : i32
    %140 = arith.addi %135, %c1_i32_46 : i32
    %141 = arith.index_cast %140 : i32 to index
    %142 = memref.load %arg3[%141] : memref<96xf32, #tpu.memory_space<smem>>
    %143 = vector.broadcast %142 : f32 to vector<16x128xf32>
    %144 = arith.mulf %6, %143 : vector<16x128xf32>
    %145 = arith.addf %139, %144 : vector<16x128xf32>
    %c2_i32_47 = arith.constant 2 : i32
    %146 = arith.addi %135, %c2_i32_47 : i32
    %147 = arith.index_cast %146 : i32 to index
    %148 = memref.load %arg3[%147] : memref<96xf32, #tpu.memory_space<smem>>
    %149 = vector.broadcast %148 : f32 to vector<16x128xf32>
    %150 = arith.mulf %8, %149 : vector<16x128xf32>
    %151 = arith.addf %145, %150 : vector<16x128xf32>
    %c3_i32_48 = arith.constant 3 : i32
    %152 = arith.addi %135, %c3_i32_48 : i32
    %153 = arith.index_cast %152 : i32 to index
    %154 = memref.load %arg3[%153] : memref<96xf32, #tpu.memory_space<smem>>
    %155 = vector.broadcast %154 : f32 to vector<16x128xf32>
    %156 = arith.mulf %10, %155 : vector<16x128xf32>
    %157 = arith.addf %151, %156 : vector<16x128xf32>
    %c4_i32_49 = arith.constant 4 : i32
    %158 = arith.addi %135, %c4_i32_49 : i32
    %159 = arith.index_cast %158 : i32 to index
    %160 = memref.load %arg3[%159] : memref<96xf32, #tpu.memory_space<smem>>
    %161 = vector.broadcast %160 : f32 to vector<16x128xf32>
    %162 = arith.mulf %12, %161 : vector<16x128xf32>
    %163 = arith.addf %157, %162 : vector<16x128xf32>
    %c5_i32_50 = arith.constant 5 : i32
    %164 = arith.addi %135, %c5_i32_50 : i32
    %165 = arith.index_cast %164 : i32 to index
    %166 = memref.load %arg3[%165] : memref<96xf32, #tpu.memory_space<smem>>
    %167 = vector.broadcast %166 : f32 to vector<16x128xf32>
    %168 = arith.mulf %14, %167 : vector<16x128xf32>
    %169 = arith.addf %163, %168 : vector<16x128xf32>
    %170 = arith.index_cast %134 : i32 to index
    %171 = memref.load %arg4[%170] : memref<16xf32, #tpu.memory_space<smem>>
    %172 = vector.broadcast %171 : f32 to vector<16x128xf32>
    %173 = arith.addf %169, %172 : vector<16x128xf32>
    %cst_51 = arith.constant 0.000000e+00 : f32
    %174 = vector.broadcast %cst_51 : f32 to vector<16x128xf32>
    %175 = arith.select %24, %173, %174 : vector<16x128xi1>, vector<16x128xf32>
    %c2_52 = arith.constant 2 : index
    %c0_53 = arith.constant 0 : index
    %176 = vector.load %arg5[%c2_52, %c0_53] : memref<8x128xf32, #tpu.memory_space<vmem>>, vector<1x128xf32>
    %cst_54 = arith.constant dense<0.000000e+00> : vector<128xf32>
    %177 = vector.multi_reduction <add>, %175, %cst_54 [0] : vector<16x128xf32> to vector<128xf32>
    %178 = vector.shape_cast %177 : vector<128xf32> to vector<1x128xf32>
    %179 = arith.addf %176, %178 : vector<1x128xf32>
    %c2_55 = arith.constant 2 : index
    %c0_56 = arith.constant 0 : index
    %180 = vector.load %arg5[%c2_55, %c0_56] : memref<8x128xf32, #tpu.memory_space<vmem>>, vector<1x128xf32>
    tpu.vector_store %arg5[%c2_55, %c0_56], %179 {strides = array<i32>} : memref<8x128xf32, #tpu.memory_space<vmem>>, vector<1x128xf32>,
    %c2_57 = arith.constant 2 : index
    %c0_58 = arith.constant 0 : index
    %181 = vector.load %arg6[%c2_57, %c0_58] : memref<8x128xf32, #tpu.memory_space<vmem>>, vector<1x128xf32>
    %182 = arith.mulf %175, %175 : vector<16x128xf32>
    %cst_59 = arith.constant dense<0.000000e+00> : vector<128xf32>
    %183 = vector.multi_reduction <add>, %182, %cst_59 [0] : vector<16x128xf32> to vector<128xf32>
    %184 = vector.shape_cast %183 : vector<128xf32> to vector<1x128xf32>
    %185 = arith.addf %181, %184 : vector<1x128xf32>
    %c2_60 = arith.constant 2 : index
    %c0_61 = arith.constant 0 : index
    %186 = vector.load %arg6[%c2_60, %c0_61] : memref<8x128xf32, #tpu.memory_space<vmem>>, vector<1x128xf32>
    tpu.vector_store %arg6[%c2_60, %c0_61], %185 {strides = array<i32>} : memref<8x128xf32, #tpu.memory_space<vmem>>, vector<1x128xf32>,
    %c8_i32_62 = arith.constant 8 : i32
    %187 = arith.muli %arg0, %c8_i32_62 : i32
    %c3_i32_63 = arith.constant 3 : i32
    %188 = arith.addi %187, %c3_i32_63 : i32
    %c6_i32_64 = arith.constant 6 : i32
    %189 = arith.muli %188, %c6_i32_64 : i32
    %190 = arith.index_cast %189 : i32 to index
    %191 = memref.load %arg3[%190] : memref<96xf32, #tpu.memory_space<smem>>
    %192 = vector.broadcast %191 : f32 to vector<16x128xf32>
    %193 = arith.mulf %4, %192 : vector<16x128xf32>
    %c1_i32_65 = arith.constant 1 : i32
    %194 = arith.addi %189, %c1_i32_65 : i32
    %195 = arith.index_cast %194 : i32 to index
    %196 = memref.load %arg3[%195] : memref<96xf32, #tpu.memory_space<smem>>
    %197 = vector.broadcast %196 : f32 to vector<16x128xf32>
    %198 = arith.mulf %6, %197 : vector<16x128xf32>
    %199 = arith.addf %193, %198 : vector<16x128xf32>
    %c2_i32_66 = arith.constant 2 : i32
    %200 = arith.addi %189, %c2_i32_66 : i32
    %201 = arith.index_cast %200 : i32 to index
    %202 = memref.load %arg3[%201] : memref<96xf32, #tpu.memory_space<smem>>
    %203 = vector.broadcast %202 : f32 to vector<16x128xf32>
    %204 = arith.mulf %8, %203 : vector<16x128xf32>
    %205 = arith.addf %199, %204 : vector<16x128xf32>
    %c3_i32_67 = arith.constant 3 : i32
    %206 = arith.addi %189, %c3_i32_67 : i32
    %207 = arith.index_cast %206 : i32 to index
    %208 = memref.load %arg3[%207] : memref<96xf32, #tpu.memory_space<smem>>
    %209 = vector.broadcast %208 : f32 to vector<16x128xf32>
    %210 = arith.mulf %10, %209 : vector<16x128xf32>
    %211 = arith.addf %205, %210 : vector<16x128xf32>
    %c4_i32_68 = arith.constant 4 : i32
    %212 = arith.addi %189, %c4_i32_68 : i32
    %213 = arith.index_cast %212 : i32 to index
    %214 = memref.load %arg3[%213] : memref<96xf32, #tpu.memory_space<smem>>
    %215 = vector.broadcast %214 : f32 to vector<16x128xf32>
    %216 = arith.mulf %12, %215 : vector<16x128xf32>
    %217 = arith.addf %211, %216 : vector<16x128xf32>
    %c5_i32_69 = arith.constant 5 : i32
    %218 = arith.addi %189, %c5_i32_69 : i32
    %219 = arith.index_cast %218 : i32 to index
    %220 = memref.load %arg3[%219] : memref<96xf32, #tpu.memory_space<smem>>
    %221 = vector.broadcast %220 : f32 to vector<16x128xf32>
    %222 = arith.mulf %14, %221 : vector<16x128xf32>
    %223 = arith.addf %217, %222 : vector<16x128xf32>
    %224 = arith.index_cast %188 : i32 to index
    %225 = memref.load %arg4[%224] : memref<16xf32, #tpu.memory_space<smem>>
    %226 = vector.broadcast %225 : f32 to vector<16x128xf32>
    %227 = arith.addf %223, %226 : vector<16x128xf32>
    %cst_70 = arith.constant 0.000000e+00 : f32
    %228 = vector.broadcast %cst_70 : f32 to vector<16x128xf32>
    %229 = arith.select %24, %227, %228 : vector<16x128xi1>, vector<16x128xf32>
    %c3_71 = arith.constant 3 : index
    %c0_72 = arith.constant 0 : index
    %230 = vector.load %arg5[%c3_71, %c0_72] : memref<8x128xf32, #tpu.memory_space<vmem>>, vector<1x128xf32>
    %cst_73 = arith.constant dense<0.000000e+00> : vector<128xf32>
    %231 = vector.multi_reduction <add>, %229, %cst_73 [0] : vector<16x128xf32> to vector<128xf32>
    %232 = vector.shape_cast %231 : vector<128xf32> to vector<1x128xf32>
    %233 = arith.addf %230, %232 : vector<1x128xf32>
    %c3_74 = arith.constant 3 : index
    %c0_75 = arith.constant 0 : index
    %234 = vector.load %arg5[%c3_74, %c0_75] : memref<8x128xf32, #tpu.memory_space<vmem>>, vector<1x128xf32>
    tpu.vector_store %arg5[%c3_74, %c0_75], %233 {strides = array<i32>} : memref<8x128xf32, #tpu.memory_space<vmem>>, vector<1x128xf32>,
    %c3_76 = arith.constant 3 : index
    %c0_77 = arith.constant 0 : index
    %235 = vector.load %arg6[%c3_76, %c0_77] : memref<8x128xf32, #tpu.memory_space<vmem>>, vector<1x128xf32>
    %236 = arith.mulf %229, %229 : vector<16x128xf32>
    %cst_78 = arith.constant dense<0.000000e+00> : vector<128xf32>
    %237 = vector.multi_reduction <add>, %236, %cst_78 [0] : vector<16x128xf32> to vector<128xf32>
    %238 = vector.shape_cast %237 : vector<128xf32> to vector<1x128xf32>
    %239 = arith.addf %235, %238 : vector<1x128xf32>
    %c3_79 = arith.constant 3 : index
    %c0_80 = arith.constant 0 : index
    %240 = vector.load %arg6[%c3_79, %c0_80] : memref<8x128xf32, #tpu.memory_space<vmem>>, vector<1x128xf32>
    tpu.vector_store %arg6[%c3_79, %c0_80], %239 {strides = array<i32>} : memref<8x128xf32, #tpu.memory_space<vmem>>, vector<1x128xf32>,
    %c8_i32_81 = arith.constant 8 : i32
    %241 = arith.muli %arg0, %c8_i32_81 : i32
    %c4_i32_82 = arith.constant 4 : i32
    %242 = arith.addi %241, %c4_i32_82 : i32
    %c6_i32_83 = arith.constant 6 : i32
    %243 = arith.muli %242, %c6_i32_83 : i32
    %244 = arith.index_cast %243 : i32 to index
    %245 = memref.load %arg3[%244] : memref<96xf32, #tpu.memory_space<smem>>
    %246 = vector.broadcast %245 : f32 to vector<16x128xf32>
    %247 = arith.mulf %4, %246 : vector<16x128xf32>
    %c1_i32_84 = arith.constant 1 : i32
    %248 = arith.addi %243, %c1_i32_84 : i32
    %249 = arith.index_cast %248 : i32 to index
    %250 = memref.load %arg3[%249] : memref<96xf32, #tpu.memory_space<smem>>
    %251 = vector.broadcast %250 : f32 to vector<16x128xf32>
    %252 = arith.mulf %6, %251 : vector<16x128xf32>
    %253 = arith.addf %247, %252 : vector<16x128xf32>
    %c2_i32_85 = arith.constant 2 : i32
    %254 = arith.addi %243, %c2_i32_85 : i32
    %255 = arith.index_cast %254 : i32 to index
    %256 = memref.load %arg3[%255] : memref<96xf32, #tpu.memory_space<smem>>
    %257 = vector.broadcast %256 : f32 to vector<16x128xf32>
    %258 = arith.mulf %8, %257 : vector<16x128xf32>
    %259 = arith.addf %253, %258 : vector<16x128xf32>
    %c3_i32_86 = arith.constant 3 : i32
    %260 = arith.addi %243, %c3_i32_86 : i32
    %261 = arith.index_cast %260 : i32 to index
    %262 = memref.load %arg3[%261] : memref<96xf32, #tpu.memory_space<smem>>
    %263 = vector.broadcast %262 : f32 to vector<16x128xf32>
    %264 = arith.mulf %10, %263 : vector<16x128xf32>
    %265 = arith.addf %259, %264 : vector<16x128xf32>
    %c4_i32_87 = arith.constant 4 : i32
    %266 = arith.addi %243, %c4_i32_87 : i32
    %267 = arith.index_cast %266 : i32 to index
    %268 = memref.load %arg3[%267] : memref<96xf32, #tpu.memory_space<smem>>
    %269 = vector.broadcast %268 : f32 to vector<16x128xf32>
    %270 = arith.mulf %12, %269 : vector<16x128xf32>
    %271 = arith.addf %265, %270 : vector<16x128xf32>
    %c5_i32_88 = arith.constant 5 : i32
    %272 = arith.addi %243, %c5_i32_88 : i32
    %273 = arith.index_cast %272 : i32 to index
    %274 = memref.load %arg3[%273] : memref<96xf32, #tpu.memory_space<smem>>
    %275 = vector.broadcast %274 : f32 to vector<16x128xf32>
    %276 = arith.mulf %14, %275 : vector<16x128xf32>
    %277 = arith.addf %271, %276 : vector<16x128xf32>
    %278 = arith.index_cast %242 : i32 to index
    %279 = memref.load %arg4[%278] : memref<16xf32, #tpu.memory_space<smem>>
    %280 = vector.broadcast %279 : f32 to vector<16x128xf32>
    %281 = arith.addf %277, %280 : vector<16x128xf32>
    %cst_89 = arith.constant 0.000000e+00 : f32
    %282 = vector.broadcast %cst_89 : f32 to vector<16x128xf32>
    %283 = arith.select %24, %281, %282 : vector<16x128xi1>, vector<16x128xf32>
    %c4_90 = arith.constant 4 : index
    %c0_91 = arith.constant 0 : index
    %284 = vector.load %arg5[%c4_90, %c0_91] : memref<8x128xf32, #tpu.memory_space<vmem>>, vector<1x128xf32>
    %cst_92 = arith.constant dense<0.000000e+00> : vector<128xf32>
    %285 = vector.multi_reduction <add>, %283, %cst_92 [0] : vector<16x128xf32> to vector<128xf32>
    %286 = vector.shape_cast %285 : vector<128xf32> to vector<1x128xf32>
    %287 = arith.addf %284, %286 : vector<1x128xf32>
    %c4_93 = arith.constant 4 : index
    %c0_94 = arith.constant 0 : index
    %288 = vector.load %arg5[%c4_93, %c0_94] : memref<8x128xf32, #tpu.memory_space<vmem>>, vector<1x128xf32>
    tpu.vector_store %arg5[%c4_93, %c0_94], %287 {strides = array<i32>} : memref<8x128xf32, #tpu.memory_space<vmem>>, vector<1x128xf32>,
    %c4_95 = arith.constant 4 : index
    %c0_96 = arith.constant 0 : index
    %289 = vector.load %arg6[%c4_95, %c0_96] : memref<8x128xf32, #tpu.memory_space<vmem>>, vector<1x128xf32>
    %290 = arith.mulf %283, %283 : vector<16x128xf32>
    %cst_97 = arith.constant dense<0.000000e+00> : vector<128xf32>
    %291 = vector.multi_reduction <add>, %290, %cst_97 [0] : vector<16x128xf32> to vector<128xf32>
    %292 = vector.shape_cast %291 : vector<128xf32> to vector<1x128xf32>
    %293 = arith.addf %289, %292 : vector<1x128xf32>
    %c4_98 = arith.constant 4 : index
    %c0_99 = arith.constant 0 : index
    %294 = vector.load %arg6[%c4_98, %c0_99] : memref<8x128xf32, #tpu.memory_space<vmem>>, vector<1x128xf32>
    tpu.vector_store %arg6[%c4_98, %c0_99], %293 {strides = array<i32>} : memref<8x128xf32, #tpu.memory_space<vmem>>, vector<1x128xf32>,
    %c8_i32_100 = arith.constant 8 : i32
    %295 = arith.muli %arg0, %c8_i32_100 : i32
    %c5_i32_101 = arith.constant 5 : i32
    %296 = arith.addi %295, %c5_i32_101 : i32
    %c6_i32_102 = arith.constant 6 : i32
    %297 = arith.muli %296, %c6_i32_102 : i32
    %298 = arith.index_cast %297 : i32 to index
    %299 = memref.load %arg3[%298] : memref<96xf32, #tpu.memory_space<smem>>
    %300 = vector.broadcast %299 : f32 to vector<16x128xf32>
    %301 = arith.mulf %4, %300 : vector<16x128xf32>
    %c1_i32_103 = arith.constant 1 : i32
    %302 = arith.addi %297, %c1_i32_103 : i32
    %303 = arith.index_cast %302 : i32 to index
    %304 = memref.load %arg3[%303] : memref<96xf32, #tpu.memory_space<smem>>
    %305 = vector.broadcast %304 : f32 to vector<16x128xf32>
    %306 = arith.mulf %6, %305 : vector<16x128xf32>
    %307 = arith.addf %301, %306 : vector<16x128xf32>
    %c2_i32_104 = arith.constant 2 : i32
    %308 = arith.addi %297, %c2_i32_104 : i32
    %309 = arith.index_cast %308 : i32 to index
    %310 = memref.load %arg3[%309] : memref<96xf32, #tpu.memory_space<smem>>
    %311 = vector.broadcast %310 : f32 to vector<16x128xf32>
    %312 = arith.mulf %8, %311 : vector<16x128xf32>
    %313 = arith.addf %307, %312 : vector<16x128xf32>
    %c3_i32_105 = arith.constant 3 : i32
    %314 = arith.addi %297, %c3_i32_105 : i32
    %315 = arith.index_cast %314 : i32 to index
    %316 = memref.load %arg3[%315] : memref<96xf32, #tpu.memory_space<smem>>
    %317 = vector.broadcast %316 : f32 to vector<16x128xf32>
    %318 = arith.mulf %10, %317 : vector<16x128xf32>
    %319 = arith.addf %313, %318 : vector<16x128xf32>
    %c4_i32_106 = arith.constant 4 : i32
    %320 = arith.addi %297, %c4_i32_106 : i32
    %321 = arith.index_cast %320 : i32 to index
    %322 = memref.load %arg3[%321] : memref<96xf32, #tpu.memory_space<smem>>
    %323 = vector.broadcast %322 : f32 to vector<16x128xf32>
    %324 = arith.mulf %12, %323 : vector<16x128xf32>
    %325 = arith.addf %319, %324 : vector<16x128xf32>
    %c5_i32_107 = arith.constant 5 : i32
    %326 = arith.addi %297, %c5_i32_107 : i32
    %327 = arith.index_cast %326 : i32 to index
    %328 = memref.load %arg3[%327] : memref<96xf32, #tpu.memory_space<smem>>
    %329 = vector.broadcast %328 : f32 to vector<16x128xf32>
    %330 = arith.mulf %14, %329 : vector<16x128xf32>
    %331 = arith.addf %325, %330 : vector<16x128xf32>
    %332 = arith.index_cast %296 : i32 to index
    %333 = memref.load %arg4[%332] : memref<16xf32, #tpu.memory_space<smem>>
    %334 = vector.broadcast %333 : f32 to vector<16x128xf32>
    %335 = arith.addf %331, %334 : vector<16x128xf32>
    %cst_108 = arith.constant 0.000000e+00 : f32
    %336 = vector.broadcast %cst_108 : f32 to vector<16x128xf32>
    %337 = arith.select %24, %335, %336 : vector<16x128xi1>, vector<16x128xf32>
    %c5_109 = arith.constant 5 : index
    %c0_110 = arith.constant 0 : index
    %338 = vector.load %arg5[%c5_109, %c0_110] : memref<8x128xf32, #tpu.memory_space<vmem>>, vector<1x128xf32>
    %cst_111 = arith.constant dense<0.000000e+00> : vector<128xf32>
    %339 = vector.multi_reduction <add>, %337, %cst_111 [0] : vector<16x128xf32> to vector<128xf32>
    %340 = vector.shape_cast %339 : vector<128xf32> to vector<1x128xf32>
    %341 = arith.addf %338, %340 : vector<1x128xf32>
    %c5_112 = arith.constant 5 : index
    %c0_113 = arith.constant 0 : index
    %342 = vector.load %arg5[%c5_112, %c0_113] : memref<8x128xf32, #tpu.memory_space<vmem>>, vector<1x128xf32>
    tpu.vector_store %arg5[%c5_112, %c0_113], %341 {strides = array<i32>} : memref<8x128xf32, #tpu.memory_space<vmem>>, vector<1x128xf32>,
    %c5_114 = arith.constant 5 : index
    %c0_115 = arith.constant 0 : index
    %343 = vector.load %arg6[%c5_114, %c0_115] : memref<8x128xf32, #tpu.memory_space<vmem>>, vector<1x128xf32>
    %344 = arith.mulf %337, %337 : vector<16x128xf32>
    %cst_116 = arith.constant dense<0.000000e+00> : vector<128xf32>
    %345 = vector.multi_reduction <add>, %344, %cst_116 [0] : vector<16x128xf32> to vector<128xf32>
    %346 = vector.shape_cast %345 : vector<128xf32> to vector<1x128xf32>
    %347 = arith.addf %343, %346 : vector<1x128xf32>
    %c5_117 = arith.constant 5 : index
    %c0_118 = arith.constant 0 : index
    %348 = vector.load %arg6[%c5_117, %c0_118] : memref<8x128xf32, #tpu.memory_space<vmem>>, vector<1x128xf32>
    tpu.vector_store %arg6[%c5_117, %c0_118], %347 {strides = array<i32>} : memref<8x128xf32, #tpu.memory_space<vmem>>, vector<1x128xf32>,
    %c8_i32_119 = arith.constant 8 : i32
    %349 = arith.muli %arg0, %c8_i32_119 : i32
    %c6_i32_120 = arith.constant 6 : i32
    %350 = arith.addi %349, %c6_i32_120 : i32
    %c6_i32_121 = arith.constant 6 : i32
    %351 = arith.muli %350, %c6_i32_121 : i32
    %352 = arith.index_cast %351 : i32 to index
    %353 = memref.load %arg3[%352] : memref<96xf32, #tpu.memory_space<smem>>
    %354 = vector.broadcast %353 : f32 to vector<16x128xf32>
    %355 = arith.mulf %4, %354 : vector<16x128xf32>
    %c1_i32_122 = arith.constant 1 : i32
    %356 = arith.addi %351, %c1_i32_122 : i32
    %357 = arith.index_cast %356 : i32 to index
    %358 = memref.load %arg3[%357] : memref<96xf32, #tpu.memory_space<smem>>
    %359 = vector.broadcast %358 : f32 to vector<16x128xf32>
    %360 = arith.mulf %6, %359 : vector<16x128xf32>
    %361 = arith.addf %355, %360 : vector<16x128xf32>
    %c2_i32_123 = arith.constant 2 : i32
    %362 = arith.addi %351, %c2_i32_123 : i32
    %363 = arith.index_cast %362 : i32 to index
    %364 = memref.load %arg3[%363] : memref<96xf32, #tpu.memory_space<smem>>
    %365 = vector.broadcast %364 : f32 to vector<16x128xf32>
    %366 = arith.mulf %8, %365 : vector<16x128xf32>
    %367 = arith.addf %361, %366 : vector<16x128xf32>
    %c3_i32_124 = arith.constant 3 : i32
    %368 = arith.addi %351, %c3_i32_124 : i32
    %369 = arith.index_cast %368 : i32 to index
    %370 = memref.load %arg3[%369] : memref<96xf32, #tpu.memory_space<smem>>
    %371 = vector.broadcast %370 : f32 to vector<16x128xf32>
    %372 = arith.mulf %10, %371 : vector<16x128xf32>
    %373 = arith.addf %367, %372 : vector<16x128xf32>
    %c4_i32_125 = arith.constant 4 : i32
    %374 = arith.addi %351, %c4_i32_125 : i32
    %375 = arith.index_cast %374 : i32 to index
    %376 = memref.load %arg3[%375] : memref<96xf32, #tpu.memory_space<smem>>
    %377 = vector.broadcast %376 : f32 to vector<16x128xf32>
    %378 = arith.mulf %12, %377 : vector<16x128xf32>
    %379 = arith.addf %373, %378 : vector<16x128xf32>
    %c5_i32_126 = arith.constant 5 : i32
    %380 = arith.addi %351, %c5_i32_126 : i32
    %381 = arith.index_cast %380 : i32 to index
    %382 = memref.load %arg3[%381] : memref<96xf32, #tpu.memory_space<smem>>
    %383 = vector.broadcast %382 : f32 to vector<16x128xf32>
    %384 = arith.mulf %14, %383 : vector<16x128xf32>
    %385 = arith.addf %379, %384 : vector<16x128xf32>
    %386 = arith.index_cast %350 : i32 to index
    %387 = memref.load %arg4[%386] : memref<16xf32, #tpu.memory_space<smem>>
    %388 = vector.broadcast %387 : f32 to vector<16x128xf32>
    %389 = arith.addf %385, %388 : vector<16x128xf32>
    %cst_127 = arith.constant 0.000000e+00 : f32
    %390 = vector.broadcast %cst_127 : f32 to vector<16x128xf32>
    %391 = arith.select %24, %389, %390 : vector<16x128xi1>, vector<16x128xf32>
    %c6 = arith.constant 6 : index
    %c0_128 = arith.constant 0 : index
    %392 = vector.load %arg5[%c6, %c0_128] : memref<8x128xf32, #tpu.memory_space<vmem>>, vector<1x128xf32>
    %cst_129 = arith.constant dense<0.000000e+00> : vector<128xf32>
    %393 = vector.multi_reduction <add>, %391, %cst_129 [0] : vector<16x128xf32> to vector<128xf32>
    %394 = vector.shape_cast %393 : vector<128xf32> to vector<1x128xf32>
    %395 = arith.addf %392, %394 : vector<1x128xf32>
    %c6_130 = arith.constant 6 : index
    %c0_131 = arith.constant 0 : index
    %396 = vector.load %arg5[%c6_130, %c0_131] : memref<8x128xf32, #tpu.memory_space<vmem>>, vector<1x128xf32>
    tpu.vector_store %arg5[%c6_130, %c0_131], %395 {strides = array<i32>} : memref<8x128xf32, #tpu.memory_space<vmem>>, vector<1x128xf32>,
    %c6_132 = arith.constant 6 : index
    %c0_133 = arith.constant 0 : index
    %397 = vector.load %arg6[%c6_132, %c0_133] : memref<8x128xf32, #tpu.memory_space<vmem>>, vector<1x128xf32>
    %398 = arith.mulf %391, %391 : vector<16x128xf32>
    %cst_134 = arith.constant dense<0.000000e+00> : vector<128xf32>
    %399 = vector.multi_reduction <add>, %398, %cst_134 [0] : vector<16x128xf32> to vector<128xf32>
    %400 = vector.shape_cast %399 : vector<128xf32> to vector<1x128xf32>
    %401 = arith.addf %397, %400 : vector<1x128xf32>
    %c6_135 = arith.constant 6 : index
    %c0_136 = arith.constant 0 : index
    %402 = vector.load %arg6[%c6_135, %c0_136] : memref<8x128xf32, #tpu.memory_space<vmem>>, vector<1x128xf32>
    tpu.vector_store %arg6[%c6_135, %c0_136], %401 {strides = array<i32>} : memref<8x128xf32, #tpu.memory_space<vmem>>, vector<1x128xf32>,
    %c8_i32_137 = arith.constant 8 : i32
    %403 = arith.muli %arg0, %c8_i32_137 : i32
    %c7_i32 = arith.constant 7 : i32
    %404 = arith.addi %403, %c7_i32 : i32
    %c6_i32_138 = arith.constant 6 : i32
    %405 = arith.muli %404, %c6_i32_138 : i32
    %406 = arith.index_cast %405 : i32 to index
    %407 = memref.load %arg3[%406] : memref<96xf32, #tpu.memory_space<smem>>
    %408 = vector.broadcast %407 : f32 to vector<16x128xf32>
    %409 = arith.mulf %4, %408 : vector<16x128xf32>
    %c1_i32_139 = arith.constant 1 : i32
    %410 = arith.addi %405, %c1_i32_139 : i32
    %411 = arith.index_cast %410 : i32 to index
    %412 = memref.load %arg3[%411] : memref<96xf32, #tpu.memory_space<smem>>
    %413 = vector.broadcast %412 : f32 to vector<16x128xf32>
    %414 = arith.mulf %6, %413 : vector<16x128xf32>
    %415 = arith.addf %409, %414 : vector<16x128xf32>
    %c2_i32_140 = arith.constant 2 : i32
    %416 = arith.addi %405, %c2_i32_140 : i32
    %417 = arith.index_cast %416 : i32 to index
    %418 = memref.load %arg3[%417] : memref<96xf32, #tpu.memory_space<smem>>
    %419 = vector.broadcast %418 : f32 to vector<16x128xf32>
    %420 = arith.mulf %8, %419 : vector<16x128xf32>
    %421 = arith.addf %415, %420 : vector<16x128xf32>
    %c3_i32_141 = arith.constant 3 : i32
    %422 = arith.addi %405, %c3_i32_141 : i32
    %423 = arith.index_cast %422 : i32 to index
    %424 = memref.load %arg3[%423] : memref<96xf32, #tpu.memory_space<smem>>
    %425 = vector.broadcast %424 : f32 to vector<16x128xf32>
    %426 = arith.mulf %10, %425 : vector<16x128xf32>
    %427 = arith.addf %421, %426 : vector<16x128xf32>
    %c4_i32_142 = arith.constant 4 : i32
    %428 = arith.addi %405, %c4_i32_142 : i32
    %429 = arith.index_cast %428 : i32 to index
    %430 = memref.load %arg3[%429] : memref<96xf32, #tpu.memory_space<smem>>
    %431 = vector.broadcast %430 : f32 to vector<16x128xf32>
    %432 = arith.mulf %12, %431 : vector<16x128xf32>
    %433 = arith.addf %427, %432 : vector<16x128xf32>
    %c5_i32_143 = arith.constant 5 : i32
    %434 = arith.addi %405, %c5_i32_143 : i32
    %435 = arith.index_cast %434 : i32 to index
    %436 = memref.load %arg3[%435] : memref<96xf32, #tpu.memory_space<smem>>
    %437 = vector.broadcast %436 : f32 to vector<16x128xf32>
    %438 = arith.mulf %14, %437 : vector<16x128xf32>
    %439 = arith.addf %433, %438 : vector<16x128xf32>
    %440 = arith.index_cast %404 : i32 to index
    %441 = memref.load %arg4[%440] : memref<16xf32, #tpu.memory_space<smem>>
    %442 = vector.broadcast %441 : f32 to vector<16x128xf32>
    %443 = arith.addf %439, %442 : vector<16x128xf32>
    %cst_144 = arith.constant 0.000000e+00 : f32
    %444 = vector.broadcast %cst_144 : f32 to vector<16x128xf32>
    %445 = arith.select %24, %443, %444 : vector<16x128xi1>, vector<16x128xf32>
    %c7 = arith.constant 7 : index
    %c0_145 = arith.constant 0 : index
    %446 = vector.load %arg5[%c7, %c0_145] : memref<8x128xf32, #tpu.memory_space<vmem>>, vector<1x128xf32>
    %cst_146 = arith.constant dense<0.000000e+00> : vector<128xf32>
    %447 = vector.multi_reduction <add>, %445, %cst_146 [0] : vector<16x128xf32> to vector<128xf32>
    %448 = vector.shape_cast %447 : vector<128xf32> to vector<1x128xf32>
    %449 = arith.addf %446, %448 : vector<1x128xf32>
    %c7_147 = arith.constant 7 : index
    %c0_148 = arith.constant 0 : index
    %450 = vector.load %arg5[%c7_147, %c0_148] : memref<8x128xf32, #tpu.memory_space<vmem>>, vector<1x128xf32>
    tpu.vector_store %arg5[%c7_147, %c0_148], %449 {strides = array<i32>} : memref<8x128xf32, #tpu.memory_space<vmem>>, vector<1x128xf32>,
    %c7_149 = arith.constant 7 : index
    %c0_150 = arith.constant 0 : index
    %451 = vector.load %arg6[%c7_149, %c0_150] : memref<8x128xf32, #tpu.memory_space<vmem>>, vector<1x128xf32>
    %452 = arith.mulf %445, %445 : vector<16x128xf32>
    %cst_151 = arith.constant dense<0.000000e+00> : vector<128xf32>
    %453 = vector.multi_reduction <add>, %452, %cst_151 [0] : vector<16x128xf32> to vector<128xf32>
    %454 = vector.shape_cast %453 : vector<128xf32> to vector<1x128xf32>
    %455 = arith.addf %451, %454 : vector<1x128xf32>
    %c7_152 = arith.constant 7 : index
    %c0_153 = arith.constant 0 : index
    %456 = vector.load %arg6[%c7_152, %c0_153] : memref<8x128xf32, #tpu.memory_space<vmem>>, vector<1x128xf32>
    tpu.vector_store %arg6[%c7_152, %c0_153], %455 {strides = array<i32>} : memref<8x128xf32, #tpu.memory_space<vmem>>, vector<1x128xf32>,
    return
  }
  func.func @transform_0(%arg0: i32, %arg1: i32) -> (i32, i32, i32) {
    %c0_i32 = arith.constant 0 : i32
    %c0_i32_0 = arith.constant 0 : i32
    %c0_i32_1 = arith.constant 0 : i32
    return %c0_i32, %arg1, %c0_i32_0 : i32, i32, i32
  }
  func.func @transform_1(%arg0: i32, %arg1: i32) -> i32 {
    %c0_i32 = arith.constant 0 : i32
    %c0_i32_0 = arith.constant 0 : i32
    return %c0_i32 : i32
  }
  func.func @transform_2(%arg0: i32, %arg1: i32) -> i32 {
    %c0_i32 = arith.constant 0 : i32
    %c0_i32_0 = arith.constant 0 : i32
    return %c0_i32 : i32
  }
  func.func @transform_3(%arg0: i32, %arg1: i32) -> (i32, i32) {
    %c0_i32 = arith.constant 0 : i32
    %c0_i32_0 = arith.constant 0 : i32
    return %arg0, %c0_i32 : i32, i32
  }
  func.func @transform_4(%arg0: i32, %arg1: i32) -> (i32, i32) {
    %c0_i32 = arith.constant 0 : i32
    %c0_i32_0 = arith.constant 0 : i32
    return %arg0, %c0_i32 : i32, i32
  }
}

</mosaic_0001>

<bundles_post_ra>
// kernel: tpu_custom_call.1
= control target key start
LH: loop header
LB: loop body
LE: loop exit
PB: predicated region body
PF: predicated region fallthrough
CT: control target
= control target key end

     0   :  { %s2206_s0 = inlined_call_operand.hbm [shape: f32[6,24,128], index: 0, kind: input, shape index: {}]   ;;  %s2207_s1 = inlined_call_operand.vmem [shape: f32[96], index: 1, kind: input, shape index: {}]   ;;  %s2208_s2 = inlined_call_operand.vmem [shape: f32[16], index: 2, kind: input, shape index: {}]   ;;  %s2209_s3 = inlined_call_operand.hbm [shape: f32[16,128], index: 3, kind: output, shape index: {0}]   ;;  %s2210_s4 = inlined_call_operand.hbm [shape: f32[16,128], index: 4, kind: output, shape index: {1}]  }
   0x1   :  { %2222 = sst [smem:[#allocation27_spill]] %s2207_s1 }
   0x2   :  { %2223 = sst [smem:[#allocation28_spill]] %s2208_s2 }
   0x3   :  { %10 = vsyncpa [#allocation3], 0 }
   0x4   :  { %12 = vsyncpa [#allocation3 + $0x1], 0 }
   0x5   :  { %13 = vsyncpa [#allocation5], 0 }
   0x6   :  { %14 = vsyncpa [#allocation8], 0 }
   0x7   :  { %15 = vsyncpa [#allocation4], 0 }
   0x8   :  { %17 = vsyncpa [#allocation4 + $0x1], 0 }
   0x9   :  { %18 = vsyncpa [#allocation11], 0 }
   0xa   :  { %20 = vsyncpa [#allocation11 + $0x1], 0  ;;  %s1457_s15 = smov 0   ;;  %s1459_s16 = smov 0  }
   0xb   :  { %s1461_s17 = smov 0   ;;  %s1463_s18 = smov 0  }
   0xc   :  { %s1465_s19 = smov 0   ;;  %s1467_s20 = smov 0  }
   0xd   :  { %s1469_s21 = smov 0   ;;  %s1471_s22 = smov 0  }
   0xe   :  { %s1473_s23 = smov 0   ;;  %s1475_s24 = smov 0  }
   0xf   :  { %s1477_s25 = smov 0  }
  0x10 LB: > { %2224 = sst [smem:[#allocation19_spill]] %s1388_s17  ;;  %s1059_s26 = sadd.s32 4294967295, %s1420_s25   ;;  %s1420_s25 = sphi %s1477_s25, %s26_s25   ;;  %s1416_s24 = sphi %s1475_s24, %s2258_s24   ;;  %s1412_s23 = sphi %s1473_s23, %s2257_s23   ;;  %s1408_s22 = sphi %s1471_s22, %s2256_s22   ;;  %s1404_s21 = sphi %s1469_s21, %s2255_s21   ;;  %s1400_s20 = sphi %s1467_s20, %s2254_s20   ;;  %s1396_s19 = sphi %s1465_s19, %s2262_s19   ;;  %s1392_s18 = sphi %s1463_s18, %s2261_s18   ;;  %s1388_s17 = sphi %s1461_s17, %s2252_s17   ;;  %s1384_s16 = sphi %s1459_s16, %s2260_s16   ;;  %s1380_s15 = sphi %s1457_s15, %s2259_s15  }
  0x11   : > { %2225 = sst [smem:[#allocation20_spill]] %s1400_s20  ;;  %s1060_s27 = sadd.s32 4294967294, %s1420_s25  }
  0x12   : > { %2226 = sst [smem:[#allocation21_spill]] %s1412_s23  ;;  %s35_s28 = sadd.s32 1, %s1412_s23 }
  0x13   : > { %2227 = sst [smem:[#allocation22_spill]] %s1416_s24  ;;  %s38_s29 = sadd.s32 1, %s1416_s24 }
  0x14   : > { %p36_p0 = scmp.ge.s32.totalorder %s35_s28, 2  ;;  %s45_s30 = sadd.s32 1, %s1400_s20 }
  0x15   : > { %p52_p1 = scmp.ne.s32.totalorder %s1400_s20, %s1396_s19  ;;  %p53_p2 = scmp.eq.s32.totalorder %s1420_s25, 0 }
  0x16   : > { %s2264_s28 = smov (%p36_p0, %s35_s28), 0  ;;  %s2266_s29 = smov (!%p36_p0, %s38_s29), %s1416_s24 }
  0x17   : > { %2228 = sst [smem:[#allocation23_spill]] %s2264_s28  ;;  %s42_s5 = ssub.s32 %s1412_s23, %s2264_s28 }
  0x18   : > { %p1523_p3 = por %p53_p2, %p52_p1  ;;  %p40_p4 = scmp.ge.s32.totalorder %s2266_s29, 2 }
  0x19   : > { %p43_p5 = scmp.eq.s32.totalorder %s42_s5, 0  ;;  %p58_p6 = scmp.ne.s32.totalorder %s1396_s19, %s1392_s18 }
  0x1a   : > { %s2229_s6 = scalar_select %p1523_p3, 1, 0 }
  0x1b   : > { %p1528_p7 = scmp.eq.s32.totalorder %s1059_s26, 0  ;;  %s2268_s29 = smov (%p40_p4, %s2266_s29), 0 }
  0x1c   : > { %2231 = sst [smem:[#allocation24_spill]] %s2268_s29  ;;  %s110_s10 = ssub.s32 %s1416_s24, %s2268_s29 }
  0x1d   : > { %s2230_s7 = scalar_select %p1528_p7, 1, 0 }
  0x1e   : > { %s1535_s8 = scalar_select %p43_p5, %s1400_s20, %s45_s30  }
  0x1f   : > { %p1539_p8 = por %p1528_p7, %p58_p6  ;;  %p111_p9 = scmp.eq.s32.totalorder %s110_s10, 0 }
  0x20   : > { %2232 = sst [smem:[#allocation25_spill]] %s1535_s8  ;;  %s113_s11 = sadd.s32 1, %s1388_s17 }
  0x21   : > { %s2233_s9 = scalar_select %p1539_p8, 1, 0 }
  0x22   : > { %p123_p10 = scmp.ne.s32.totalorder %s1388_s17, %s1384_s16  ;;  %p124_p11 = scmp.eq.s32.totalorder %s1059_s26, 3 }
  0x23   : > { %s1549_s12 = scalar_select %p111_p9, %s1388_s17, %s113_s11  }
  0x24   : > { %p1551_p12 = por %p124_p11, %p123_p10  ;;  %p129_p13 = scmp.ne.s32.totalorder %s1384_s16, %s1380_s15 }
  0x25   : > { %2234 = sst [smem:[#allocation26_spill]] %s1549_s12  ;;  %p130_p0 = scmp.eq.s32.totalorder %s1060_s27, 3 }
  0x26   : > { %s2235_s13 = scalar_select %p1551_p12, 1, 0 }
  0x27   : > { %p1061_p1 = scmp.ge.s32.totalorder %s1420_s25, 1  ;;  %p163_p2 = scmp.lt.s32.totalorder %s1420_s25, 5 }
  0x28   : > { %p1559_p4 = por %p130_p0, %p129_p13  ;;  %s2238_s1 = sld [smem:[#allocation27_spill]] }
  0x29   : > { %p1563_p5 = pnand %p1061_p1, %p163_p2  ;;  %s2239_s2 = sld [smem:[#allocation28_spill]] }
  0x2a   : > { %s2236_s14 = scalar_select %p1559_p4, 1, 0 }
  0x2b   : > { %s2237_s18 = scalar_select %p1563_p5, 1, 0 }
  0x2c   : > { %p1113_p6 = pneg %p1563_p5 }
  0x2e   : > { %s176_s5 = sshll.u32 %s2238_s1, 4  ;;  %p1577_p9 = pnand %p1113_p6, %p1528_p7  ;;  %s177_s5 = int_to_ptr.vmem [resolvable:$true] %s176_s5 }
  0x2f   : > { %s187_s27 = sshll.u32 %s2239_s2, 4  ;;  %s1228_s28 = scalar_lea.vmem %s177_s5, 16  ;;  %s188_s27 = int_to_ptr.vmem [resolvable:$true] %s187_s27 }
  0x30   : > { %p1229_p10 = scmp.ne.s32.totalorder %s177_s5, %s1228_s28  ;;  %p1230_p11 = pneg %p1577_p9 }
  0x31   : > { %p1236_p1 = scmp.lt.s32.totalorder %s177_s5, %s177_s5  ;;  %p1237_p2 = scmp.lt.s32.totalorder %s1228_s28, %s1228_s28 }
  0x32   : > { %p1231_p13 = pnand %p1230_p11, %p1229_p10 }
  0x33   : > { %p1238_p4 = por %p1237_p2, %p1236_p1 }
  0x34   : > { %p1232_p0 = pneg %p1231_p13 }
  0x36   : > { %p1239_p12 = pnand %p1238_p4, %p1232_p0 }
  0x38   : > { %1242 = shalt.err (!%p1239_p12)
}
  0x39   : > { %s1422_s30 = smov [#allocation6]   ;;  %s1243_s26 = scalar_lea.vmem %s188_s27, 16 }
  0x3a   : > { %1116 = dma.vmem_to_smem (!%p1577_p9), %s177_s5, 16, %s1422_s30, [#allocation5]  }
  0x3b   : > { %p1244_p6 = scmp.ne.s32.totalorder %s188_s27, %s1243_s26  ;;  %p1251_p5 = scmp.lt.s32.totalorder %s188_s27, %s188_s27 }
  0x3c   : > { %p1252_p3 = scmp.lt.s32.totalorder %s1243_s26, %s1243_s26 }
  0x3d   : > { %p1246_p7 = pnand %p1244_p6, %p1230_p11 }
  0x3e   : > { %p1253_p10 = por %p1252_p3, %p1251_p5 }
  0x3f   : > { %p1247_p8 = pneg %p1246_p7 }
  0x41   : > { %p1254_p13 = pnand %p1253_p10, %p1247_p8 }
  0x43   : > { %1257 = shalt.err (!%p1254_p13)
}
  0x44   : > { %s1423_s10 = smov [#allocation7]   ;;  %p1064_p4 = scmp.ge.s32.totalorder %s1420_s25, 4 }
  0x45   : > { %1119 = dma.vmem_to_smem (!%p1577_p9), %s188_s27, 16, %s1423_s10, [#allocation8]  }
  0x46   : > { %194 = sbr.rel (%p1064_p4) target bundleno = 102 (0x66), region = 24  ;;  %p2241_p12 = scmp.ne.s32.totalorder (!%p1064_p4), %s2229_s6, 0 }
  0x4d   : > { %197 = sbr.rel (!%p2241_p12) target bundleno = 102 (0x66), region = 28 }
  0x54   : > { %s198_s28 = sand.u32 1, %s1400_s20   ;;  %s1065_s5 = sshll.u32 %s1412_s23, 1 }
  0x55   : > { %s1098_s11 = smul.u32 96, %s198_s28  ;;  %s204_s30 = ssub.s32 3, %s1065_s5 }
  0x56   : > { %p205_p7 = scmp.lt.s32.totalorder %s204_s30, 2  ;;  %s199_s2 = scalar_lea.sflag [#allocation3], %s198_s28 }
  0x57   : > { %s202_s24 = scalar_lea.vmem [#allocation2], %s1098_s11 }
  0x58   : > { %s2270_s30 = smov (!%p205_p7, %s204_s30), 2 }
  0x59   : > { %s207_s26 = smul.u32 768, %s2270_s30 }
  0x5b   : > { %s209_s1 = ssub.s32 1536, %s207_s26 }
  0x5c   : > { %210 = vsyncadd %s199_s2, %s209_s1  ;;  %p1066_p3 = scmp.ne.s32.totalorder %s207_s26, 0  ;;  %s1097_s29 = sshll.u32 %s1412_s23, 8 }
  0x5d   : > { %s213_s6 = scalar_lea.hbm %s2206_s0, %s1097_s29  ;;  %s220_s8 = sld [smem:[#allocation0]]  }
  0x5e   : > { %s228_s12 = sshll.u32 %s202_s24, 4  ;;  %s1424_s20 = smov 384   ;;  %s229_s12 = int_to_ptr.vmem [resolvable:$true] %s228_s12 }
  0x5f   : > { %235 = sst [smem:[#allocation13]] %s1424_s20  ;;  %s1425_s5 = smov 256  }
  0x60   : > { %239 = sst [smem:[#allocation13 + $0x2]] %s2270_s30  ;;  %s1426_s17 = smov 128  }
  0x61   : > { %237 = sst [smem:[#allocation13 + $0x1]] %s1425_s5  ;;  %s1427_s11 = smov 8  }
  0x62   : > { %241 = sst [smem:[#allocation13 + $0x3]] %s1426_s17  ;;  %s1428_s23 = smov [#allocation12]  }
  0x63   : > { %s1070_s28 = sshll.u32 %s220_s8, 26  ;;  %243 = sst [smem:[#allocation13 + $0x4]] %s1426_s17 }
  0x64   : > { %s1071_s1 = sadd.s32 134217728, %s1070_s28  ;;  %245 = sst [smem:[#allocation13 + $0x5]] %s1427_s11 }
  0x65   : > { %247 = dma.general (%p1066_p3), %s213_s6, %s207_s26, %s229_s12, %s199_s2, %s1428_s23, [#allocation13], %s1071_s1, 0  }
  0x66 PF: > { %p2242_p8 = scmp.ne.s32.totalorder %s2237_s18, 0 }
  0x67   : > { %s255_s20 = sand.u32 (!%p2242_p8), 1, %s1396_s19   ;;  %p2243_p5 = scmp.ne.s32.totalorder (!%p2242_p8), %s2233_s9, 0 }
  0x68   : > { %253 = sbr.rel (%p2242_p8) target bundleno = 294 (0x126), region = 32  ;;  %s256_s30 = scalar_lea.sflag (!%p2242_p8), [#allocation3], %s255_s20 }
  0x69   : > { %s1099_s24 = smul.u32 (!%p2242_p8), 96, %s255_s20 }
  0x6b   : > { %s1600_s29 = scalar_lea.vmem (!%p2242_p8), [#allocation2], %s1099_s24 }
  0x6f   : > { %1359 = dma.done.wait (%p2243_p5), %s256_s30, 1536  }
  0x70   : > { %1361 = vsyncadd (%p2243_p5), %s256_s30, 4294965760  ;;  %p2244_p9 = scmp.ne.s32.totalorder %s2230_s7, 0 }
  0x72   : > { %1363 = dma.done.wait (%p2244_p9), [#allocation5], 16  }
  0x73   : > { %1365 = vsyncadd (%p2244_p9), [#allocation5], 4294967280 }
  0x74   : > { %1367 = dma.done.wait (%p2244_p9), [#allocation8], 16  }
  0x75   : > { %1369 = vsyncadd (%p2244_p9), [#allocation8], 4294967280 }
  0x76   : > { %272 = sfence }
  0x77   : > { %s1615_s2 = sand.u32 1, %s1384_s16   ;;  %p1078_p11 = scmp.ne.s32.totalorder %s1404_s21, 0 }
  0x78   : > { %s1076_s17 = sshll.u32 %s1615_s2, 3  ;;  %v1429_v0 = vmov (!%p1078_p11), 0.0  }
  0x79   : > { %s1618_s23 = scalar_lea.vmem [#allocation9], %s1076_s17  ;;  %s1620_s8 = scalar_lea.vmem [#allocation10], %s1076_s17 }
  0x7a   : > { %306 = sbr.rel (%p1078_p11) target bundleno = 129 (0x81), region = 48  ;;  %307 = vst [vmem:[%s1618_s23] sm:$0xff] (!%p1078_p11), %v1429_v0  ;;  %308 = vst [vmem:[%s1620_s8] sm:$0xff] (!%p1078_p11), %v1429_v0 }
  0x81 PF: > { %s1626_s7 = sshll.u32 %s1408_s22, 3  ;;  %v326_v1 = vlaneseq  ;;  %s1089_s9 = sshll.u32 %s1404_s21, 4  ;;  %v1641_v3 = vld [vmem:[%s1600_s29] sm:$0xff]  ;;  %v1644_v4 = vld [vmem:[%s1600_s29 + $0x8] sm:$0xff]  ;;  %v1649_v6 = vld [vmem:[%s1600_s29 + $0x10] sm:$0xff] }
  0x82   : > { %s341_s12 = smul.u32 48, %s1408_s22  ;;  %s1631_s18 = sld [smem:[#allocation7 + %s1626_s7]]  ;;  %v330_v5 = vstv %s1089_s9  ;;  %v1652_v7 = vld [vmem:[%s1600_s29 + $0x18] sm:$0xff]  ;;  %v1661_v9 = vld [vmem:[%s1600_s29 + $0x20] sm:$0xff]  ;;  %v1664_v10 = vld [vmem:[%s1600_s29 + $0x28] sm:$0xff] }
  0x83   : > { %s409_s26 = sadd.s32 1, %s1626_s7  ;;  %v327_v2 = vshrl.u32 %v326_v1, 7  ;;  %v1654_v8 = vand.u32 127, %v326_v1  ;;  %v1670_v13 = vld [vmem:[%s1600_s29 + $0x30] sm:$0xff]  ;;  %v1673_v14 = vld [vmem:[%s1600_s29 + $0x38] sm:$0xff]  ;;  %v1691_v22 = vld [vmem:[%s1600_s29 + $0x40] sm:$0xff] }
  0x84   : > { %s342_s27 = sld [smem:[#allocation6 + %s341_s12]]  ;;  %s346_s10 = sadd.s32 1, %s341_s12  ;;  %v1694_v23 = vld [vmem:[%s1600_s29 + $0x48] sm:$0xff]  ;;  %v1704_v27 = vld [vmem:[%s1600_s29 + $0x50] sm:$0xff]  ;;  %v1707_v28 = vld [vmem:[%s1600_s29 + $0x58] sm:$0xff] }
  0x85   : > { %s1634_s6 = sld [smem:[#allocation6 + %s346_s10]]  ;;  %s353_s5 = sadd.s32 2, %s341_s12  ;;  %v328_v11 = vadd.s32 8, %v327_v2  ;;  %v1675_v15 = vadd.s32 %v330_v5, %v327_v2  ;;  %vm337_vm0 = vcmp.lt.s32.totalorder %v1654_v8, 48 }
  0x86   : > { %s1636_s28 = sld [smem:[#allocation6 + %s353_s5]]  ;;  %s360_s1 = sadd.s32 3, %s341_s12 }
  0x87   : > { %s1638_s11 = sld [smem:[#allocation6 + %s360_s1]]  ;;  %s367_s21 = sadd.s32 4, %s341_s12  ;;  %v332_v33 = vadd.s32 %v330_v5, %v328_v11  ;;  %vm333_vm1 = vcmp.lt.s32.totalorder %v1675_v15, 24 }
  0x88   : > { %s1646_s20 = sld [smem:[#allocation6 + %s367_s21]]  ;;  %s374_s24 = sadd.s32 5, %s341_s12  ;;  %v382_v42 = vstv %s1631_s18  ;;  %vm1758_vm3 = vmand %vm333_vm1, %vm337_vm0 }
  0x89   : > { %s1656_s30 = sld [smem:[#allocation6 + %s374_s24]]  ;;  %s1658_s17 = smul.u32 6, %s409_s26  ;;  %vm334_vm2 = vcmp.lt.s32.totalorder %v332_v33, 24 }
  0x8a   : > { %v343_v12 = vstv %s342_s27  ;;  %s1666_s9 = sld [smem:[#allocation7 + %s409_s26]]  ;;  %s478_s12 = sadd.s32 2, %s1626_s7  ;;  %vm1768_vm4 = vmand %vm334_vm2, %vm337_vm0 }
  0x8b   : > { %v344_v16 = vmul.f32 %v343_v12, %v1641_v3  ;;  %v345_v17 = vmul.f32 %v343_v12, %v1644_v4  ;;  %v348_v18 = vstv %s1634_s6  ;;  %s1681_s27 = sld [smem:[#allocation6 + %s1658_s17]]  ;;  %s415_s26 = sadd.s32 1, %s1658_s17 }
  0x8c   : > { %v349_v19 = vmul.f32 %v1649_v6, %v348_v18  ;;  %v350_v20 = vmul.f32 %v1652_v7, %v348_v18  ;;  %v355_v21 = vstv %s1636_s28  ;;  %s1687_s10 = sld [smem:[#allocation6 + %s415_s26]]  ;;  %s422_s5 = sadd.s32 2, %s1658_s17 }
  0x8d   : > { %v356_v24 = vmul.f32 %v1661_v9, %v355_v21  ;;  %v357_v25 = vmul.f32 %v1664_v10, %v355_v21  ;;  %v362_v26 = vstv %s1638_s11  ;;  %s1700_s6 = sld [smem:[#allocation6 + %s422_s5]]  ;;  %s429_s28 = sadd.s32 3, %s1658_s17 }
  0x8e   : > { %v351_v29 = vadd.f32 %v349_v19, %v344_v16  ;;  %v352_v30 = vadd.f32 %v350_v20, %v345_v17  ;;  %v363_v31 = vmul.f32 %v1670_v13, %v362_v26  ;;  %v364_v32 = vmul.f32 %v1673_v14, %v362_v26  ;;  %s1711_s1 = sld [smem:[#allocation6 + %s429_s28]]  ;;  %s436_s11 = sadd.s32 4, %s1658_s17 }
  0x8f   : > { %v369_v34 = vstv %s1646_s20  ;;  %v376_v35 = vstv %s1656_s30  ;;  %s1717_s29 = sld [smem:[#allocation6 + %s436_s11]]  ;;  %s443_s21 = sadd.s32 5, %s1658_s17 }
  0x90   : > { %v358_v36 = vadd.f32 %v356_v24, %v351_v29  ;;  %v359_v37 = vadd.f32 %v357_v25, %v352_v30  ;;  %v370_v38 = vmul.f32 %v1691_v22, %v369_v34  ;;  %v371_v39 = vmul.f32 %v1694_v23, %v369_v34  ;;  %s1724_s24 = smul.u32 6, %s478_s12  ;;  %s1730_s20 = sld [smem:[#allocation6 + %s443_s21]] }
  0x91   : > { %v377_v40 = vmul.f32 %v1704_v27, %v376_v35  ;;  %v378_v41 = vmul.f32 %v1707_v28, %v376_v35  ;;  %v412_v43 = vstv %s1681_s27  ;;  %s1734_s30 = sld [smem:[#allocation7 + %s478_s12]]  ;;  %v451_v50 = vstv %s1666_s9  ;;  %s547_s5 = sadd.s32 3, %s1626_s7 }
  0x92   : > { %v365_v44 = vadd.f32 %v363_v31, %v358_v36  ;;  %v366_v45 = vadd.f32 %v364_v32, %v359_v37  ;;  %v413_v46 = vmul.f32 %v412_v43, %v1641_v3  ;;  %v414_v47 = vmul.f32 %v412_v43, %v1644_v4  ;;  %s1739_s17 = sld [smem:[#allocation6 + %s1724_s24]]  ;;  %s484_s26 = sadd.s32 1, %s1724_s24 }
  0x93   : > { %v417_v48 = vstv %s1687_s10  ;;  %v424_v49 = vstv %s1700_s6  ;;  %s1745_s18 = sld [smem:[#allocation6 + %s484_s26]]  ;;  %s491_s12 = sadd.s32 2, %s1724_s24 }
  0x94   : > { %v372_v51 = vadd.f32 %v370_v38, %v365_v44  ;;  %v373_v52 = vadd.f32 %v371_v39, %v366_v45  ;;  %v418_v53 = vmul.f32 %v1649_v6, %v417_v48  ;;  %v419_v54 = vmul.f32 %v1652_v7, %v417_v48  ;;  %s1762_s27 = sld [smem:[#allocation6 + %s491_s12]]  ;;  %s498_s10 = sadd.s32 3, %s1724_s24 }
  0x95   : > { %v425_v55 = vmul.f32 %v1661_v9, %v424_v49  ;;  %v426_v56 = vmul.f32 %v1664_v10, %v424_v49  ;;  %v431_v57 = vstv %s1711_s1  ;;  %v438_v58 = vstv %s1717_s29  ;;  %s1780_s6 = sld [smem:[#allocation6 + %s498_s10]]  ;;  %s505_s28 = sadd.s32 4, %s1724_s24 }
  0x96   : > { %v379_v60 = vadd.f32 %v377_v40, %v372_v51  ;;  %v380_v61 = vadd.f32 %v378_v41, %v373_v52  ;;  %v420_v62 = vadd.f32 %v418_v53, %v413_v46  ;;  %v421_v63 = vadd.f32 %v419_v54, %v414_v47  ;;  %s512_s1 = sadd.s32 5, %s1724_s24  ;;  %s1792_s11 = sld [smem:[#allocation6 + %s505_s28]] }
  0x97   : > { %v432_v1 = vmul.f32 %v1670_v13, %v431_v57  ;;  %v433_v2 = vmul.f32 %v1673_v14, %v431_v57  ;;  %v439_v5 = vmul.f32 %v1691_v22, %v438_v58  ;;  %v440_v11 = vmul.f32 %v1694_v23, %v438_v58  ;;  %s1796_s29 = smul.u32 6, %s547_s5  ;;  %s1802_s21 = sld [smem:[#allocation6 + %s512_s1]] }
  0x98   : > { %v383_v12 = vadd.f32 %v382_v42, %v379_v60  ;;  %v384_v15 = vadd.f32 %v382_v42, %v380_v61  ;;  %v427_v16 = vadd.f32 %v425_v55, %v420_v62  ;;  %v428_v17 = vadd.f32 %v426_v56, %v421_v63  ;;  %p2249_p1 = scmp.ne.s32.totalorder %s2235_s13, 0 }
  0x99   : > { %v445_v8 = vstv %s1730_s20  ;;  %v481_v18 = vstv %s1739_s17  ;;  %v486_v19 = vstv %s1745_s18  ;;  %v520_v20 = vstv %s1734_s30  ;;  %s553_s24 = sadd.s32 1, %s1796_s29  ;;  %s1813_s20 = sld [smem:[#allocation6 + %s1796_s29]] }
  0x9a   : > { %v385_v21 = vsel %vm1758_vm3, %v383_v12, 0.0  ;;  %v386_v24 = vsel %vm1768_vm4, %v384_v15, 0.0  ;;  %v434_v25 = vadd.f32 %v432_v1, %v427_v16  ;;  %v435_v26 = vadd.f32 %v433_v2, %v428_v17  ;;  %s560_s9 = sadd.s32 2, %s1796_s29  ;;  %s567_s17 = sadd.s32 3, %s1796_s29 }
  0x9b   : > { %v388_v29 = vadd.f32 %v386_v24, %v385_v21  ;;  %v398_v30 = vmul.f32 %v385_v21, %v385_v21  ;;  %v399_v31 = vmul.f32 %v386_v24, %v386_v24  ;;  %v446_v32 = vmul.f32 %v1704_v27, %v445_v8  ;;  %s1822_s26 = sld [smem:[#allocation6 + %s553_s24]]  ;;  %s574_s10 = sadd.s32 4, %s1796_s29 }
  0x9c   : > { %v441_v33 = vadd.f32 %v439_v5, %v434_v25  ;;  %v442_v34 = vadd.f32 %v440_v11, %v435_v26  ;;  %v447_v35 = vmul.f32 %v1707_v28, %v445_v8  ;;  %v482_v36 = vmul.f32 %v481_v18, %v1641_v3  ;;  %s1827_s18 = sld [smem:[#allocation6 + %s560_s9]] }
  0x9d   : > { %v389_v37 = vrot.slane %v388_v29, 4  ;;  %v400_v38 = vadd.f32 %v399_v31, %v398_v30  ;;  %v483_v39 = vmul.f32 %v481_v18, %v1644_v4  ;;  %v487_v40 = vmul.f32 %v1649_v6, %v486_v19  ;;  %s1829_s12 = sld [smem:[#allocation6 + %s567_s17]] }
  0x9e   : > { %v448_v41 = vadd.f32 %v446_v32, %v441_v33  ;;  %v449_v42 = vadd.f32 %v447_v35, %v442_v34  ;;  %v488_v43 = vmul.f32 %v1652_v7, %v486_v19  ;;  %v493_v44 = vstv %s1762_s27  ;;  %v387_v19 = vld [vmem:[%s1618_s23] sm:$0x1]  ;;  %s616_s27 = sadd.s32 4, %s1626_s7  ;;  %v397_v33 = vld [vmem:[%s1620_s8] sm:$0x1]  ;;  %s1849_s1 = sld [smem:[#allocation6 + %s574_s10]] }
  0x9f   : > { %v390_v45 = vadd.f32 %v389_v37, %v388_v29  ;;  %v401_v46 = vrot.slane %v400_v38, 4  ;;  %v489_v47 = vadd.f32 %v487_v40, %v482_v36  ;;  %v494_v48 = vmul.f32 %v1661_v9, %v493_v44  ;;  %s1843_s28 = smul.u32 6, %s616_s27  ;;  %s1871_s30 = sld [smem:[#allocation7 + %s547_s5]] }
  0xa0   : > { %v452_v49 = vadd.f32 %v451_v50, %v448_v41  ;;  %v453_v51 = vadd.f32 %v451_v50, %v449_v42  ;;  %v490_v52 = vadd.f32 %v488_v43, %v483_v39  ;;  %v495_v53 = vmul.f32 %v1664_v10, %v493_v44 }
  0xa1   : > { %v391_v54 = vrot.slane %v390_v45, 2  ;;  %v402_v55 = vadd.f32 %v401_v46, %v400_v38  ;;  %v496_v56 = vadd.f32 %v494_v48, %v489_v47  ;;  %v500_v57 = vstv %s1780_s6  ;;  %s581_s6 = sadd.s32 5, %s1796_s29  ;;  %s622_s29 = sadd.s32 1, %s1843_s28 }
  0xa2   : > { %v454_v58 = vsel %vm1758_vm3, %v452_v49, 0.0  ;;  %v455_v60 = vsel %vm1768_vm4, %v453_v51, 0.0  ;;  %v497_v61 = vadd.f32 %v495_v53, %v490_v52  ;;  %v501_v50 = vmul.f32 %v1670_v13, %v500_v57  ;;  %s1874_s24 = sld [smem:[#allocation6 + %s1843_s28]]  ;;  %s636_s9 = sadd.s32 3, %s1843_s28 }
  0xa3   : > { %v392_v62 = vadd.f32 %v391_v54, %v390_v45  ;;  %v403_v63 = vrot.slane %v402_v55, 2  ;;  %v457_v1 = vadd.f32 %v455_v60, %v454_v58  ;;  %v467_v2 = vmul.f32 %v454_v58, %v454_v58  ;;  %s643_s17 = sadd.s32 4, %s1843_s28  ;;  %s650_s10 = sadd.s32 5, %s1843_s28 }
  0xa4   : > { %v468_v5 = vmul.f32 %v455_v60, %v455_v60  ;;  %v502_v11 = vmul.f32 %v1673_v14, %v500_v57  ;;  %v503_v12 = vadd.f32 %v501_v50, %v496_v56  ;;  %v507_v15 = vstv %s1792_s11  ;;  %s1851_s11 = sld [smem:[#allocation6 + %s581_s6]]  ;;  %v456_v60 = vld [vmem:[%s1618_s23 + $0x1] sm:$0x1] }
  0xa5   : > { %v393_v16 = vrot.slane %v392_v62, 1  ;;  %v404_v17 = vadd.f32 %v403_v63, %v402_v55  ;;  %v458_v8 = vrot.slane %v457_v1, 4  ;;  %v508_v18 = vmul.f32 %v1691_v22, %v507_v15 }
  0xa6   : > { %v469_v21 = vadd.f32 %v468_v5, %v467_v2  ;;  %v504_v24 = vadd.f32 %v502_v11, %v497_v61  ;;  %v509_v25 = vmul.f32 %v1694_v23, %v507_v15  ;;  %v514_v26 = vstv %s1802_s21  ;;  %s629_s21 = sadd.s32 2, %s1843_s28  ;;  %s1911_s28 = sld [smem:[#allocation6 + %s650_s10]] }
  0xa7   : > { %v394_v29 = vadd.f32 %v393_v16, %v392_v62  ;;  %v405_v30 = vrot.slane %v404_v17, 1  ;;  %v459_v31 = vadd.f32 %v458_v8, %v457_v1  ;;  %v510_v32 = vadd.f32 %v508_v18, %v503_v12  ;;  %s1880_s5 = sld [smem:[#allocation6 + %s629_s21]]  ;;  %v466_v8 = vld [vmem:[%s1620_s8 + $0x1] sm:$0x1] }
  0xa8   : > { %v470_v34 = vrot.slane %v469_v21, 4  ;;  %v511_v35 = vadd.f32 %v509_v25, %v504_v24  ;;  %v515_v36 = vmul.f32 %v1704_v27, %v514_v26  ;;  %v516_v37 = vmul.f32 %v1707_v28, %v514_v26 }
  0xa9   : > { %v395_v38 = vadd.f32 %v394_v29, %v387_v19  ;;  %v406_v39 = vadd.f32 %v405_v30, %v404_v17  ;;  %v460_v40 = vrot.slane %v459_v31, 2  ;;  %v550_v41 = vstv %s1813_s20  ;;  %s1878_s20 = sld [smem:[#allocation6 + %s622_s29]] }
  0xaa   : > { %v471_v42 = vadd.f32 %v470_v34, %v469_v21  ;;  %v517_v43 = vadd.f32 %v515_v36, %v510_v32  ;;  %v518_v44 = vadd.f32 %v516_v37, %v511_v35  ;;  %v551_v45 = vmul.f32 %v550_v41, %v1641_v3  ;;  %s1922_s29 = sld [smem:[#allocation7 + %s616_s27]] }
  0xab   : > { %396 = vst [vmem:[%s1618_s23] sm:$0x1] %v395_v38  ;;  %v407_v46 = vadd.f32 %v406_v39, %v397_v33  ;;  %v461_v47 = vadd.f32 %v460_v40, %v459_v31  ;;  %v552_v48 = vmul.f32 %v550_v41, %v1644_v4  ;;  %v555_v49 = vstv %s1822_s26  ;;  %s685_s26 = sadd.s32 5, %s1626_s7 }
  0xac   : > { %v472_v51 = vrot.slane %v471_v42, 2  ;;  %v521_v52 = vadd.f32 %v520_v20, %v517_v43  ;;  %v522_v53 = vadd.f32 %v520_v20, %v518_v44  ;;  %v556_v54 = vmul.f32 %v1649_v6, %v555_v49  ;;  %s1901_s6 = smul.u32 6, %s685_s26 }
  0xad   : > { %408 = vst [vmem:[%s1620_s8] sm:$0x1] %v407_v46  ;;  %v462_v55 = vrot.slane %v461_v47, 1  ;;  %v557_v56 = vmul.f32 %v1652_v7, %v555_v49  ;;  %v562_v57 = vstv %s1827_s18  ;;  %v569_v58 = vstv %s1829_s12  ;;  %s1892_s18 = sld [smem:[#allocation6 + %s636_s9]] }
  0xae   : > { %v473_v61 = vadd.f32 %v472_v51, %v471_v42  ;;  %v523_v50 = vsel %vm1758_vm3, %v521_v52, 0.0  ;;  %v524_v62 = vsel %vm1768_vm4, %v522_v53, 0.0  ;;  %v558_v20 = vadd.f32 %v556_v54, %v551_v45  ;;  %s1894_s12 = sld [smem:[#allocation6 + %s643_s17]] }
  0xaf   : > { %v463_v63 = vadd.f32 %v462_v55, %v461_v47  ;;  %v526_v1 = vadd.f32 %v524_v62, %v523_v50  ;;  %v536_v2 = vmul.f32 %v523_v50, %v523_v50  ;;  %v537_v5 = vmul.f32 %v524_v62, %v524_v62  ;;  %s1925_s21 = sld [smem:[#allocation6 + %s1901_s6]] }
  0xb0   : > { %v474_v11 = vrot.slane %v473_v61, 1  ;;  %v559_v12 = vadd.f32 %v557_v56, %v552_v48  ;;  %v563_v15 = vmul.f32 %v1661_v9, %v562_v57  ;;  %v564_v16 = vmul.f32 %v1664_v10, %v562_v57 }
  0xb1   : > { %v464_v17 = vadd.f32 %v463_v63, %v456_v60  ;;  %v527_v18 = vrot.slane %v526_v1, 4  ;;  %v538_v19 = vadd.f32 %v537_v5, %v536_v2  ;;  %v570_v21 = vmul.f32 %v1670_v13, %v569_v58  ;;  %v525_v60 = vld [vmem:[%s1618_s23 + $0x2] sm:$0x1] }
  0xb2   : > { %v475_v24 = vadd.f32 %v474_v11, %v473_v61  ;;  %v565_v25 = vadd.f32 %v563_v15, %v558_v20  ;;  %v566_v26 = vadd.f32 %v564_v16, %v559_v12  ;;  %v571_v29 = vmul.f32 %v1673_v14, %v569_v58  ;;  %v535_v11 = vld [vmem:[%s1620_s8 + $0x2] sm:$0x1] }
  0xb3   : > { %465 = vst [vmem:[%s1618_s23 + $0x1] sm:$0x1] %v464_v17  ;;  %v528_v30 = vadd.f32 %v527_v18, %v526_v1  ;;  %v539_v31 = vrot.slane %v538_v19, 4  ;;  %v576_v32 = vstv %s1849_s1  ;;  %v583_v33 = vstv %s1851_s11  ;;  %s691_s1 = sadd.s32 1, %s1901_s6  ;;  %s698_s11 = sadd.s32 2, %s1901_s6 }
  0xb4   : > { %v476_v34 = vadd.f32 %v475_v24, %v466_v8  ;;  %v572_v35 = vadd.f32 %v570_v21, %v565_v25  ;;  %v573_v36 = vadd.f32 %v571_v29, %v566_v26  ;;  %v577_v37 = vmul.f32 %v1691_v22, %v576_v32  ;;  %s1934_s27 = sld [smem:[#allocation6 + %s698_s11]] }
  0xb5   : > { %v529_v38 = vrot.slane %v528_v30, 2  ;;  %v540_v39 = vadd.f32 %v539_v31, %v538_v19  ;;  %v578_v40 = vmul.f32 %v1694_v23, %v576_v32  ;;  %v584_v41 = vmul.f32 %v1704_v27, %v583_v33 }
  0xb6   : > { %477 = vst [vmem:[%s1620_s8 + $0x1] sm:$0x1] %v476_v34  ;;  %v579_v42 = vadd.f32 %v577_v37, %v572_v35  ;;  %v585_v43 = vmul.f32 %v1707_v28, %v583_v33  ;;  %v589_v44 = vstv %s1871_s30  ;;  %v619_v45 = vstv %s1874_s24  ;;  %s1932_s30 = sld [smem:[#allocation6 + %s691_s1]]  ;;  %s705_s24 = sadd.s32 3, %s1901_s6 }
  0xb7   : > { %v530_v46 = vadd.f32 %v529_v38, %v528_v30  ;;  %v541_v47 = vrot.slane %v540_v39, 2  ;;  %v580_v48 = vadd.f32 %v578_v40, %v573_v36  ;;  %v620_v49 = vmul.f32 %v619_v45, %v1641_v3  ;;  %s1947_s9 = sld [smem:[#allocation6 + %s705_s24]] }
  0xb8   : > { %v586_v51 = vadd.f32 %v584_v41, %v579_v42  ;;  %v621_v52 = vmul.f32 %v619_v45, %v1644_v4  ;;  %v624_v53 = vstv %s1878_s20  ;;  %v631_v54 = vstv %s1880_s5  ;;  %s712_s20 = sadd.s32 4, %s1901_s6  ;;  %s754_s5 = sadd.s32 6, %s1626_s7 }
  0xb9   : > { %v531_v55 = vrot.slane %v530_v46, 1  ;;  %v542_v56 = vadd.f32 %v541_v47, %v540_v39  ;;  %v587_v57 = vadd.f32 %v585_v43, %v580_v48  ;;  %v625_v58 = vmul.f32 %v1649_v6, %v624_v53  ;;  %s1949_s17 = sld [smem:[#allocation6 + %s712_s20]] }
  0xba   : > { %v590_v61 = vadd.f32 %v589_v44, %v586_v51  ;;  %v626_v50 = vmul.f32 %v1652_v7, %v624_v53  ;;  %v632_v62 = vmul.f32 %v1661_v9, %v631_v54  ;;  %v633_v20 = vmul.f32 %v1664_v10, %v631_v54  ;;  %s1975_s1 = sld [smem:[#allocation7 + %s685_s26]] }
  0xbb   : > { %v532_v63 = vadd.f32 %v531_v55, %v530_v46  ;;  %v543_v1 = vrot.slane %v542_v56, 1  ;;  %v591_v2 = vadd.f32 %v589_v44, %v587_v57  ;;  %v627_v5 = vadd.f32 %v625_v58, %v620_v49 }
  0xbc   : > { %v592_v12 = vsel %vm1758_vm3, %v590_v61, 0.0  ;;  %v628_v15 = vadd.f32 %v626_v50, %v621_v52  ;;  %v638_v16 = vstv %s1892_s18  ;;  %v645_v17 = vstv %s1894_s12  ;;  %s719_s18 = sadd.s32 5, %s1901_s6  ;;  %s1957_s12 = smul.u32 6, %s754_s5 }
  0xbd   : > { %v533_v8 = vadd.f32 %v532_v63, %v525_v60  ;;  %v544_v18 = vadd.f32 %v543_v1, %v542_v56  ;;  %v593_v19 = vsel %vm1768_vm4, %v591_v2, 0.0  ;;  %v605_v21 = vmul.f32 %v592_v12, %v592_v12  ;;  %s1965_s10 = sld [smem:[#allocation6 + %s719_s18]] }
  0xbe   : > { %v595_v24 = vadd.f32 %v593_v19, %v592_v12  ;;  %v606_v25 = vmul.f32 %v593_v19, %v593_v19  ;;  %v634_v26 = vadd.f32 %v632_v62, %v627_v5  ;;  %v635_v29 = vadd.f32 %v633_v20, %v628_v15  ;;  %s760_s6 = sadd.s32 1, %s1957_s12  ;;  %s1978_s11 = sld [smem:[#allocation6 + %s1957_s12]] }
  0xbf   : > { %534 = vst [vmem:[%s1618_s23 + $0x2] sm:$0x1] %v533_v8  ;;  %v545_v30 = vadd.f32 %v544_v18, %v535_v11  ;;  %v639_v31 = vmul.f32 %v1670_v13, %v638_v16  ;;  %v640_v32 = vmul.f32 %v1673_v14, %v638_v16  ;;  %v646_v33 = vmul.f32 %v1691_v22, %v645_v17  ;;  %v594_v16 = vld [vmem:[%s1618_s23 + $0x3] sm:$0x1]  ;;  %s774_s26 = sadd.s32 3, %s1957_s12  ;;  %s781_s24 = sadd.s32 4, %s1957_s12 }
  0xc0   : > { %v596_v34 = vrot.slane %v595_v24, 4  ;;  %v607_v35 = vadd.f32 %v606_v25, %v605_v21  ;;  %v647_v36 = vmul.f32 %v1694_v23, %v645_v17  ;;  %v652_v37 = vstv %s1911_s28  ;;  %s767_s28 = sadd.s32 2, %s1957_s12  ;;  %s788_s20 = sadd.s32 5, %s1957_s12 }
  0xc1   : > { %546 = vst [vmem:[%s1620_s8 + $0x2] sm:$0x1] %v545_v30  ;;  %v641_v38 = vadd.f32 %v639_v31, %v634_v26  ;;  %v642_v39 = vadd.f32 %v640_v32, %v635_v29  ;;  %v653_v40 = vmul.f32 %v1704_v27, %v652_v37  ;;  %v654_v41 = vmul.f32 %v1707_v28, %v652_v37  ;;  %v604_v29 = vld [vmem:[%s1620_s8 + $0x3] sm:$0x1]  ;;  %s2018_s18 = sld [smem:[#allocation6 + %s788_s20]] }
  0xc2   : > { %v597_v42 = vadd.f32 %v596_v34, %v595_v24  ;;  %v608_v43 = vrot.slane %v607_v35, 4  ;;  %v658_v44 = vstv %s1922_s29  ;;  %v688_v45 = vstv %s1925_s21  ;;  %s1982_s29 = sld [smem:[#allocation6 + %s760_s6]] }
  0xc3   : > { %v648_v46 = vadd.f32 %v646_v33, %v641_v38  ;;  %v649_v47 = vadd.f32 %v647_v36, %v642_v39  ;;  %v689_v48 = vmul.f32 %v688_v45, %v1641_v3  ;;  %v690_v49 = vmul.f32 %v688_v45, %v1644_v4  ;;  %s1984_s21 = sld [smem:[#allocation6 + %s767_s28]] }
  0xc4   : > { %v598_v51 = vrot.slane %v597_v42, 2  ;;  %v609_v52 = vadd.f32 %v608_v43, %v607_v35  ;;  %v693_v53 = vstv %s1932_s30  ;;  %v700_v54 = vstv %s1934_s27  ;;  %s823_s30 = sadd.s32 7, %s1626_s7  ;;  %s1999_s27 = sld [smem:[#allocation6 + %s774_s26]] }
  0xc5   : > { %v655_v55 = vadd.f32 %v653_v40, %v648_v46  ;;  %v656_v56 = vadd.f32 %v654_v41, %v649_v47  ;;  %v694_v57 = vmul.f32 %v1649_v6, %v693_v53  ;;  %v695_v58 = vmul.f32 %v1652_v7, %v693_v53  ;;  %s2029_s6 = sld [smem:[#allocation7 + %s754_s5]]  ;;  %s1093_s7 = sshll.u32 %s1408_s22, 7 }
  0xc6   : > { %v599_v60 = vadd.f32 %v598_v51, %v597_v42  ;;  %v610_v61 = vrot.slane %v609_v52, 2  ;;  %v701_v50 = vmul.f32 %v1661_v9, %v700_v54  ;;  %v702_v62 = vmul.f32 %v1664_v10, %v700_v54  ;;  %s2080_s20 = sld [smem:[#allocation7 + %s823_s30]] }
  0xc7   : > { %v659_v20 = vadd.f32 %v658_v44, %v655_v55  ;;  %v660_v63 = vadd.f32 %v658_v44, %v656_v56  ;;  %v696_v1 = vadd.f32 %v694_v57, %v689_v48  ;;  %v697_v2 = vadd.f32 %v695_v58, %v690_v49 }
  0xc8   : > { %v600_v5 = vrot.slane %v599_v60, 1  ;;  %v611_v11 = vadd.f32 %v610_v61, %v609_v52  ;;  %v707_v12 = vstv %s1947_s9  ;;  %v714_v15 = vstv %s1949_s17  ;;  %s2008_s9 = smul.u32 6, %s823_s30  ;;  %s2016_s17 = sld [smem:[#allocation6 + %s781_s24]] }
  0xc9   : > { %v661_v17 = vsel %vm1758_vm3, %v659_v20, 0.0  ;;  %v662_v8 = vsel %vm1768_vm4, %v660_v63, 0.0  ;;  %v703_v18 = vadd.f32 %v701_v50, %v696_v1  ;;  %v704_v19 = vadd.f32 %v702_v62, %v697_v2  ;;  %s911_s30 = sshll.u32 %s1618_s23, 4  ;;  %s2114_s30 = int_to_ptr.vmem [resolvable:$true] %s911_s30 }
  0xca   : > { %v601_v21 = vadd.f32 %v600_v5, %v599_v60  ;;  %v612_v24 = vrot.slane %v611_v11, 1  ;;  %v664_v25 = vadd.f32 %v662_v8, %v661_v17  ;;  %v674_v26 = vmul.f32 %v661_v17, %v661_v17  ;;  %s829_s12 = sadd.s32 1, %s2008_s9  ;;  %s2032_s28 = sld [smem:[#allocation6 + %s2008_s9]] }
  0xcb   : > { %v675_v30 = vmul.f32 %v662_v8, %v662_v8  ;;  %v708_v31 = vmul.f32 %v1670_v13, %v707_v12  ;;  %v709_v32 = vmul.f32 %v1673_v14, %v707_v12  ;;  %v715_v33 = vmul.f32 %v1691_v22, %v714_v15  ;;  %s843_s5 = sadd.s32 3, %s2008_s9  ;;  %s857_s26 = sadd.s32 5, %s2008_s9 }
  0xcc   : > { %v602_v34 = vadd.f32 %v601_v21, %v594_v16  ;;  %v613_v35 = vadd.f32 %v612_v24, %v611_v11  ;;  %v665_v36 = vrot.slane %v664_v25, 4  ;;  %v716_v37 = vmul.f32 %v1694_v23, %v714_v15  ;;  %v663_v16 = vld [vmem:[%s1618_s23 + $0x4] sm:$0x1]  ;;  %s2066_s24 = sld [smem:[#allocation6 + %s857_s26]] }
  0xcd   : > { %v676_v38 = vadd.f32 %v675_v30, %v674_v26  ;;  %v710_v39 = vadd.f32 %v708_v31, %v703_v18  ;;  %v711_v40 = vadd.f32 %v709_v32, %v704_v19  ;;  %v721_v41 = vstv %s1965_s10  ;;  %s836_s10 = sadd.s32 2, %s2008_s9 }
  0xce   : > { %603 = vst [vmem:[%s1618_s23 + $0x3] sm:$0x1] %v602_v34  ;;  %v614_v42 = vadd.f32 %v613_v35, %v604_v29  ;;  %v666_v43 = vadd.f32 %v665_v36, %v664_v25  ;;  %v722_v44 = vmul.f32 %v1704_v27, %v721_v41  ;;  %v723_v45 = vmul.f32 %v1707_v28, %v721_v41  ;;  %v673_v34 = vld [vmem:[%s1620_s8 + $0x4] sm:$0x1] }
  0xcf   : > { %v677_v46 = vrot.slane %v676_v38, 4  ;;  %v717_v47 = vadd.f32 %v715_v33, %v710_v39  ;;  %v718_v48 = vadd.f32 %v716_v37, %v711_v40  ;;  %v727_v49 = vstv %s1975_s1  ;;  %s2040_s1 = sld [smem:[#allocation6 + %s829_s12]]  ;;  %s2112_s12 = scalar_lea.hbm %s2209_s3, %s1093_s7 }
  0xd0   : > { %615 = vst [vmem:[%s1620_s8 + $0x3] sm:$0x1] %v614_v42  ;;  %v667_v51 = vrot.slane %v666_v43, 2  ;;  %v757_v52 = vstv %s1978_s11  ;;  %v762_v53 = vstv %s1982_s29  ;;  %v769_v54 = vstv %s1984_s21  ;;  %s2042_s11 = sld [smem:[#allocation6 + %s836_s10]]  ;;  %s850_s21 = sadd.s32 4, %s2008_s9 }
  0xd1   : > { %v678_v55 = vadd.f32 %v677_v46, %v676_v38  ;;  %v724_v56 = vadd.f32 %v722_v44, %v717_v47  ;;  %v725_v57 = vadd.f32 %v723_v45, %v718_v48  ;;  %v758_v58 = vmul.f32 %v757_v52, %v1641_v3  ;;  %s2050_s29 = sld [smem:[#allocation6 + %s843_s5]]  ;;  %s924_s9 = sshll.u32 %s1620_s8, 4  ;;  %s2122_s9 = int_to_ptr.vmem [resolvable:$true] %s924_s9 }
  0xd2   : > { %v668_v60 = vadd.f32 %v667_v51, %v666_v43  ;;  %v759_v61 = vmul.f32 %v757_v52, %v1644_v4  ;;  %v763_v50 = vmul.f32 %v1649_v6, %v762_v53  ;;  %v764_v62 = vmul.f32 %v1652_v7, %v762_v53 }
  0xd3   : > { %v679_v20 = vrot.slane %v678_v55, 2  ;;  %v728_v63 = vadd.f32 %v727_v49, %v724_v56  ;;  %v729_v1 = vadd.f32 %v727_v49, %v725_v57  ;;  %v770_v2 = vmul.f32 %v1661_v9, %v769_v54 }
  0xd4   : > { %v669_v5 = vrot.slane %v668_v60, 1  ;;  %v765_v11 = vadd.f32 %v763_v50, %v758_v58  ;;  %v766_v12 = vadd.f32 %v764_v62, %v759_v61  ;;  %v771_v15 = vmul.f32 %v1664_v10, %v769_v54 }
  0xd5   : > { %v680_v17 = vadd.f32 %v679_v20, %v678_v55  ;;  %v730_v8 = vsel %vm1758_vm3, %v728_v63, 0.0  ;;  %v731_v18 = vsel %vm1768_vm4, %v729_v1, 0.0  ;;  %v776_v19 = vstv %s1999_s27  ;;  %s2064_s27 = sld [smem:[#allocation6 + %s850_s21]] }
  0xd6   : > { %v670_v21 = vadd.f32 %v669_v5, %v668_v60  ;;  %v733_v24 = vadd.f32 %v731_v18, %v730_v8  ;;  %v743_v25 = vmul.f32 %v730_v8, %v730_v8  ;;  %v744_v26 = vmul.f32 %v731_v18, %v731_v18 }
  0xd7   : > { %v681_v29 = vrot.slane %v680_v17, 1  ;;  %v772_v30 = vadd.f32 %v770_v2, %v765_v11  ;;  %v773_v31 = vadd.f32 %v771_v15, %v766_v12  ;;  %v777_v32 = vmul.f32 %v1670_v13, %v776_v19 }
  0xd8   : > { %v671_v33 = vadd.f32 %v670_v21, %v663_v16  ;;  %v734_v35 = vrot.slane %v733_v24, 4  ;;  %v745_v36 = vadd.f32 %v744_v26, %v743_v25  ;;  %v778_v37 = vmul.f32 %v1673_v14, %v776_v19  ;;  %v732_v16 = vld [vmem:[%s1618_s23 + $0x5] sm:$0x1]  ;;  %v742_v21 = vld [vmem:[%s1620_s8 + $0x5] sm:$0x1] }
  0xd9   : > { %v682_v38 = vadd.f32 %v681_v29, %v680_v17  ;;  %v779_v39 = vadd.f32 %v777_v32, %v772_v30  ;;  %v783_v40 = vstv %s2016_s17  ;;  %v790_v41 = vstv %s2018_s18 }
  0xda   : > { %672 = vst [vmem:[%s1618_s23 + $0x4] sm:$0x1] %v671_v33  ;;  %v735_v42 = vadd.f32 %v734_v35, %v733_v24  ;;  %v746_v43 = vrot.slane %v745_v36, 4  ;;  %v780_v44 = vadd.f32 %v778_v37, %v773_v31  ;;  %v784_v45 = vmul.f32 %v1691_v22, %v783_v40 }
  0xdb   : > { %v683_v46 = vadd.f32 %v682_v38, %v673_v34  ;;  %v785_v47 = vmul.f32 %v1694_v23, %v783_v40  ;;  %v791_v48 = vmul.f32 %v1704_v27, %v790_v41  ;;  %v792_v49 = vmul.f32 %v1707_v28, %v790_v41 }
  0xdc   : > { %v736_v51 = vrot.slane %v735_v42, 2  ;;  %v747_v52 = vadd.f32 %v746_v43, %v745_v36  ;;  %v786_v53 = vadd.f32 %v784_v45, %v779_v39  ;;  %v796_v54 = vstv %s2029_s6  ;;  %s2120_s6 = scalar_lea.hbm %s2210_s4, %s1093_s7 }
  0xdd   : > { %684 = vst [vmem:[%s1620_s8 + $0x4] sm:$0x1] %v683_v46  ;;  %v787_v55 = vadd.f32 %v785_v47, %v780_v44  ;;  %v826_v56 = vstv %s2032_s28  ;;  %v831_v57 = vstv %s2040_s1  ;;  %v838_v58 = vstv %s2042_s11  ;;  %s893_s28 = scalar_lea.sflag [#allocation4], %s1615_s2  ;;  %s1258_s1 = scalar_lea.vmem %s2114_s30, 128 }
  0xde   : > { %v737_v60 = vadd.f32 %v736_v51, %v735_v42  ;;  %v748_v61 = vrot.slane %v747_v52, 2  ;;  %v793_v50 = vadd.f32 %v791_v48, %v786_v53  ;;  %v827_v62 = vmul.f32 %v826_v56, %v1641_v3  ;;  %p1259_p0 = scmp.ne.s32.totalorder %s2114_s30, %s1258_s1  ;;  %s1430_s11 = smov [#allocation9]  }
  0xdf   : > { %v794_v20 = vadd.f32 %v792_v49, %v787_v55  ;;  %v828_v63 = vmul.f32 %v826_v56, %v1644_v4  ;;  %v832_v1 = vmul.f32 %v1649_v6, %v831_v57  ;;  %v833_v2 = vmul.f32 %v1652_v7, %v831_v57  ;;  %v801_v56 = vld [vmem:[%s1618_s23 + $0x6] sm:$0x1]  ;;  %s1262_s5 = sshll.u32 %s1430_s11, 4  ;;  %s1263_s5 = int_to_ptr.vmem [resolvable:$false] %s1262_s5 }
  0xe0   : > { %v738_v5 = vrot.slane %v737_v60, 1  ;;  %v749_v11 = vadd.f32 %v748_v61, %v747_v52  ;;  %v797_v12 = vadd.f32 %v796_v54, %v793_v50  ;;  %v839_v15 = vmul.f32 %v1661_v9, %v838_v58  ;;  %p1260_p2 = pnand %p1259_p0, %p2249_p1  ;;  %p1265_p10 = scmp.lt.s32.totalorder %s2114_s30, %s1263_s5 }
  0xe1   : > { %v798_v17 = vadd.f32 %v796_v54, %v794_v20  ;;  %v834_v8 = vadd.f32 %v832_v1, %v827_v62  ;;  %v835_v18 = vadd.f32 %v833_v2, %v828_v63  ;;  %v840_v3 = vmul.f32 %v1664_v10, %v838_v58  ;;  %v811_v62 = vld [vmem:[%s1620_s8 + $0x6] sm:$0x1] }
  0xe2   : > { %v739_v19 = vadd.f32 %v738_v5, %v737_v60  ;;  %v750_v4 = vrot.slane %v749_v11, 1  ;;  %v799_v6 = vsel %vm1758_vm3, %v797_v12, 0.0  ;;  %v845_v7 = vstv %s2050_s29  ;;  %p1261_p6 = pneg %p1260_p2  ;;  %s1264_s29 = scalar_lea.vmem %s1263_s5, 256 }
  0xe3   : > { %v800_v9 = vsel %vm1768_vm4, %v798_v17, 0.0  ;;  %v812_v24 = vmul.f32 %v799_v6, %v799_v6  ;;  %v841_v25 = vadd.f32 %v839_v15, %v834_v8  ;;  %v842_v26 = vadd.f32 %v840_v3, %v835_v18  ;;  %v870_v18 = vld [vmem:[%s1618_s23 + $0x7] sm:$0x1]  ;;  %p1266_p13 = scmp.lt.s32.totalorder %s1264_s29, %s1258_s1 }
  0xe4   : > { %v740_v10 = vadd.f32 %v739_v19, %v732_v16  ;;  %v751_v29 = vadd.f32 %v750_v4, %v749_v11  ;;  %v802_v30 = vadd.f32 %v800_v9, %v799_v6  ;;  %v813_v31 = vmul.f32 %v800_v9, %v800_v9 }
  0xe5   : > { %v846_v32 = vmul.f32 %v1670_v13, %v845_v7  ;;  %v847_v33 = vmul.f32 %v1673_v14, %v845_v7  ;;  %v852_v34 = vstv %s2064_s27  ;;  %v859_v35 = vstv %s2066_s24  ;;  %v880_v7 = vld [vmem:[%s1620_s8 + $0x7] sm:$0x1]  ;;  %p1267_p4 = por %p1266_p13, %p1265_p10 }
  0xe6   : > { %741 = vst [vmem:[%s1618_s23 + $0x5] sm:$0x1] %v740_v10  ;;  %v752_v36 = vadd.f32 %v751_v29, %v742_v21  ;;  %v803_v37 = vrot.slane %v802_v30, 4  ;;  %v814_v38 = vadd.f32 %v813_v31, %v812_v24  ;;  %v853_v39 = vmul.f32 %v1691_v22, %v852_v34 }
  0xe7   : > { %v848_v40 = vadd.f32 %v846_v32, %v841_v25  ;;  %v849_v41 = vadd.f32 %v847_v33, %v842_v26  ;;  %v854_v42 = vmul.f32 %v1694_v23, %v852_v34  ;;  %v860_v43 = vmul.f32 %v1704_v27, %v859_v35  ;;  %p1268_p12 = pnand %p1267_p4, %p1261_p6 }
  0xe8   : > { %753 = vst [vmem:[%s1620_s8 + $0x5] sm:$0x1] %v752_v36  ;;  %v804_v44 = vadd.f32 %v803_v37, %v802_v30  ;;  %v815_v13 = vrot.slane %v814_v38, 4  ;;  %v861_v14 = vmul.f32 %v1707_v28, %v859_v35  ;;  %v865_v49 = vstv %s2080_s20 }
  0xe9   : > { %v855_v45 = vadd.f32 %v853_v39, %v848_v40  ;;  %v856_v46 = vadd.f32 %v854_v42, %v849_v41 }
  0xea   : > { %v805_v47 = vrot.slane %v804_v44, 2  ;;  %v816_v48 = vadd.f32 %v815_v13, %v814_v38 }
  0xeb   : > { %v862_v51 = vadd.f32 %v860_v43, %v855_v45  ;;  %v863_v22 = vadd.f32 %v861_v14, %v856_v46 }
  0xec   : > { %v806_v52 = vadd.f32 %v805_v47, %v804_v44  ;;  %v817_v53 = vrot.slane %v816_v48, 2 }
  0xed   : > { %v866_v54 = vadd.f32 %v865_v49, %v862_v51  ;;  %v867_v23 = vadd.f32 %v865_v49, %v863_v22 }
  0xee   : > { %v807_v27 = vrot.slane %v806_v52, 1  ;;  %v818_v55 = vadd.f32 %v817_v53, %v816_v48 }
  0xef   : > { %v868_v57 = vsel %vm1758_vm3, %v866_v54, 0.0  ;;  %v869_v28 = vsel %vm1768_vm4, %v867_v23, 0.0 }
  0xf0   : > { %v808_v58 = vadd.f32 %v807_v27, %v806_v52  ;;  %v819_v60 = vrot.slane %v818_v55, 1  ;;  %v871_v61 = vadd.f32 %v869_v28, %v868_v57  ;;  %v881_v50 = vmul.f32 %v868_v57, %v868_v57 }
  0xf1   : > { %v882_v20 = vmul.f32 %v869_v28, %v869_v28 }
  0xf2   : > { %v809_v63 = vadd.f32 %v808_v58, %v801_v56  ;;  %v820_v1 = vadd.f32 %v819_v60, %v818_v55  ;;  %v872_v2 = vrot.slane %v871_v61, 4 }
  0xf3   : > { %v883_v5 = vadd.f32 %v882_v20, %v881_v50 }
  0xf4   : > { %810 = vst [vmem:[%s1618_s23 + $0x6] sm:$0x1] %v809_v63  ;;  %v821_v59 = vadd.f32 %v820_v1, %v811_v62  ;;  %v873_v11 = vadd.f32 %v872_v2, %v871_v61 }
  0xf5   : > { %v884_v0 = vrot.slane %v883_v5, 4 }
  0xf6   : > { %822 = vst [vmem:[%s1620_s8 + $0x6] sm:$0x1] %v821_v59  ;;  %v874_v12 = vrot.slane %v873_v11, 2 }
  0xf7   : > { %v885_v15 = vadd.f32 %v884_v0, %v883_v5 }
  0xf8   : > { %v875_v16 = vadd.f32 %v874_v12, %v873_v11 }
  0xf9   : > { %v886_v17 = vrot.slane %v885_v15, 2 }
  0xfa   : > { %v876_v8 = vrot.slane %v875_v16, 1 }
  0xfb   : > { %v887_v3 = vadd.f32 %v886_v17, %v885_v15 }
  0xfc   : > { %v877_v19 = vadd.f32 %v876_v8, %v875_v16 }
  0xfd   : > { %v888_v4 = vrot.slane %v887_v3, 1 }
  0xfe   : > { %v878_v6 = vadd.f32 %v877_v19, %v870_v18 }
  0xff   : > { %v889_v21 = vadd.f32 %v888_v4, %v887_v3 }
 0x100   : > { %879 = vst [vmem:[%s1618_s23 + $0x7] sm:$0x1] %v878_v6 }
 0x101   : > { %v890_v9 = vadd.f32 %v889_v21, %v880_v7 }
 0x102   : > { %1271 = shalt.err (!%p1268_p12)
}
 0x103   : > { %s1272_s23 = scalar_lea.hbm %s2112_s12, 128  ;;  %s1276_s27 = scalar_lea.hbm %s2209_s3, 256 }
 0x104   : > { %p1273_p7 = scmp.ne.s32.totalorder %s2112_s12, %s1272_s23  ;;  %p1277_p5 = scmp.lt.u32.totalorder %s2112_s12, %s2209_s3 }
 0x105   : > { %p1278_p9 = scmp.lt.u32.totalorder %s1276_s27, %s1272_s23  ;;  %p1280_p0 = scmp.lt.u32.totalorder %s1272_s23, %s2112_s12 }
 0x106   : > { %p1274_p3 = pnand %p1273_p7, %p2249_p1 }
 0x107   : > { %p1279_p11 = por %p1278_p9, %p1277_p5 }
 0x108   : > { %p1275_p8 = pneg %p1274_p3 }
 0x109   : > { %p1281_p2 = por %p1280_p0, %p1279_p11 }
 0x10b   : > { %p1282_p6 = pnand %p1281_p2, %p1275_p8 }
 0x10d   : > { %1285 = shalt.err (!%p1282_p6)
}
 0x10e   : > { %1109 = dma.vmem_to_hbm [thread:$0]  (%p2249_p1), %s2114_s30, 128, %s2112_s12, %s893_s28   ;;  %891 = vst [vmem:[%s1620_s8 + $0x7] sm:$0x1] %v890_v9 }
 0x10f   : > { %s898_s7 = scalar_lea.sflag [#allocation11], %s1615_s2  ;;  %s1286_s17 = scalar_lea.vmem %s2122_s9, 128 }
 0x110   : > { %p1287_p10 = scmp.ne.s32.totalorder %s2122_s9, %s1286_s17  ;;  %s1431_s18 = smov [#allocation10]  }
 0x111   : > { %s1290_s22 = sshll.u32 %s1431_s18, 4  ;;  %s1291_s22 = int_to_ptr.vmem [resolvable:$false] %s1290_s22 }
 0x112   : > { %p1288_p13 = pnand %p1287_p10, %p2249_p1  ;;  %s1292_s10 = scalar_lea.vmem %s1291_s22, 256 }
 0x113   : > { %p1293_p12 = scmp.lt.s32.totalorder %s2122_s9, %s1291_s22  ;;  %p1294_p7 = scmp.lt.s32.totalorder %s1292_s10, %s1286_s17 }
 0x114   : > { %p1289_p4 = pneg %p1288_p13 }
 0x115   : > { %p1295_p3 = por %p1294_p7, %p1293_p12 }
 0x117   : > { %p1296_p8 = pnand %p1295_p3, %p1289_p4 }
 0x119   : > { %1299 = shalt.err (!%p1296_p8)
}
 0x11a   : > { %s1300_s2 = scalar_lea.hbm %s2120_s6, 128  ;;  %s1304_s12 = scalar_lea.hbm %s2210_s4, 256 }
 0x11b   : > { %p1301_p5 = scmp.ne.s32.totalorder %s2120_s6, %s1300_s2  ;;  %p1305_p0 = scmp.lt.u32.totalorder %s2120_s6, %s2210_s4 }
 0x11c   : > { %p1306_p2 = scmp.lt.u32.totalorder %s1304_s12, %s1300_s2  ;;  %p1308_p10 = scmp.lt.u32.totalorder %s1300_s2, %s2120_s6 }
 0x11d   : > { %p1302_p9 = pnand %p1301_p5, %p2249_p1 }
 0x11e   : > { %p1307_p6 = por %p1306_p2, %p1305_p0 }
 0x11f   : > { %p1303_p11 = pneg %p1302_p9 }
 0x120   : > { %p1309_p13 = por %p1308_p10, %p1307_p6 }
 0x122   : > { %p1310_p4 = pnand %p1309_p13, %p1303_p11 }
 0x124   : > { %1313 = shalt.err (!%p1310_p4)
}
 0x125   : > { %1110 = dma.vmem_to_hbm [thread:$0]  (%p2249_p1), %s2122_s9, 128, %s2120_s6, %s898_s7  }
 0x126 PF: > { %p1131_p12 = scmp.ge.s32.totalorder %s1420_s25, 2  ;;  %s936_s11 = sand.u32 1, %s1380_s15  }
 0x127   : > { %p2250_p7 = scmp.ne.s32.totalorder %s2236_s14, 0  ;;  %s937_s5 = scalar_lea.sflag [#allocation4], %s936_s11 }
 0x129   : > { %p1121_p3 = pnand %p1131_p12, %p2250_p7 }
 0x12b   : > { %1371 = dma.done.wait (!%p1121_p3), %s937_s5, 128  }
 0x12c   : > { %1373 = vsyncadd (!%p1121_p3), %s937_s5, 4294967168  ;;  %s946_s29 = scalar_lea.sflag [#allocation11], %s936_s11 }
 0x12d   : > { %1375 = dma.done.wait (!%p1121_p3), %s946_s29, 128  }
 0x12e   : > { %1377 = vsyncadd (!%p1121_p3), %s946_s29, 4294967168  ;;  %s26_s25 = sadd.s32 1, %s1420_s25   ;;  %s2251_s13 = sld [smem:[#allocation19_spill]] }
 0x12f   : > { %p23_p8 = scmp.ge.s32.totalorder %s26_s25, 6   ;;  %s2252_s17 = sld [smem:[#allocation26_spill]] }
 0x130   : > { %s2253_s9 = sld [smem:[#allocation20_spill]]  ;;  %s2254_s20 = sld [smem:[#allocation25_spill]] }
 0x131   : > { %s2255_s21 = sld [smem:[#allocation21_spill]]  ;;  %s2256_s22 = sld [smem:[#allocation22_spill]] }
 0x132   : > { %s2257_s23 = sld [smem:[#allocation23_spill]]  ;;  %s2258_s24 = sld [smem:[#allocation24_spill]] }
 0x133   : > { %s2259_s15 = smov %s1384_s16  ;;  %s2261_s18 = smov %s1396_s19 }
 0x134   : > { %s2260_s16 = smov %s2251_s13  ;;  %25 = sbr.rel (!%p23_p8) target bundleno = 16 (0x10), region = 117 }
 0x136   : > { %s2262_s19 = smov %s2253_s9 }
 0x13b   :  { %951 = vsyncpa [#allocation3], 1 }
 0x13c   :  { %953 = vsyncpa [#allocation3 + $0x1], 1 }
 0x13d   :  { %954 = vsyncpa [#allocation4], 1 }
 0x13e   :  { %956 = vsyncpa [#allocation4 + $0x1], 1 }
 0x13f   :  { %957 = vsyncpa [#allocation11], 1 }
 0x140   :  { %959 = vsyncpa [#allocation11 + $0x1], 1 }
 0x141   :  { %960 = vsyncpa [#allocation5], 1 }
 0x142   :  { %962 = vsyncpa [#allocation5 + $0x1], 1 }
 0x143   :  { %963 = vsyncpa [#allocation8], 1 }

</bundles_post_ra>
